<compile_context>
chip_gen: v7x
topology: tpu7x:2x2x1
jax: 0.10.0
libtpu: 0.0.40
codegen_flags: <defaults>
</compile_context>

<pallas_src>
import functools
import numpy as np
import jax
import jax.numpy as jnp
from jax import lax
from jax.experimental import pallas as pl
from jax.experimental.pallas import tpu as pltpu

_EPS = 1e-5
_MARGIN = 128          # lane-aligned shifted-read margin; must be >= (W+2) + 1


def _round_up(v, m):
    return (v + m - 1) // m * m


def _make_kernel(CP, Wp, L, margin, n_valid):
    """Fused BasicBlock kernel on the channel-major, zero-halo flat layout."""
    inv_cnt = 1.0 / float(n_valid)
    # tap order (kh, kw)-major; matches the (CP, 9*CP) weight packing
    offs = [(kh - 1) * Wp + (kw - 1) for kh in range(3) for kw in range(3)]

    def im2col(src):
        # src: (CP, L + 2*margin) f32.  One tile-aligned sublane concat of the 9
        # shifted slices -> (9*CP, L), cast once to bf16 for the MXU.
        cols = [src[:, margin + d: margin + d + L] for d in offs]
        return jnp.concatenate(cols, axis=0).astype(jnp.bfloat16)

    def kernel(x_ref, vm_ref, w1_ref, w2_ref, g1_ref, b1_ref, g2_ref, b2_ref,
               out_ref):
        x_ext = x_ref[...]                       # (CP, L + 2*margin) f32
        vm = vm_ref[...]                         # (1, L) 0/1 valid-pixel mask

        def bn_fold(o, g, b):
            # One-pass batch stats over the N*H*W valid pixels only (halo
            # excluded), affine folded: y = o*a + c.
            om = o * vm
            mean = jnp.sum(om, axis=1, keepdims=True) * inv_cnt
            msq = jnp.sum(om * om, axis=1, keepdims=True) * inv_cnt
            a = g * lax.rsqrt(msq - mean * mean + _EPS)
            return a, b - mean * a

        # conv1 (single im2col matmul) -> bn1 -> relu; halo re-zeroed so conv2's
        # shifted reads see real zeros.
        c1 = jnp.dot(w1_ref[...], im2col(x_ext),
                     preferred_element_type=jnp.float32)          # (CP, L) f32
        a1, s1 = bn_fold(c1, g1_ref[...], b1_ref[...])
        h1 = jnp.maximum(c1 * a1 + s1, 0.0) * vm

        # conv2 -> bn2 -> + identity -> relu (fused epilogue).  Halo outputs are
        # don't-cares; the wrapper slices out the valid pixels.
        zpad = jnp.zeros((CP, margin), jnp.float32)
        h1_ext = jnp.concatenate([zpad, h1, zpad], axis=1)        # lane-aligned
        c2 = jnp.dot(w2_ref[...], im2col(h1_ext),
                     preferred_element_type=jnp.float32)          # (CP, L) f32
        a2, s2 = bn_fold(c2, g2_ref[...], b2_ref[...])
        y = c2 * a2 + s2 + x_ext[:, margin: margin + L]           # residual
        out_ref[...] = jnp.maximum(y, 0.0)

    return kernel


def _valid_mask(N, H, W, L):
    Hp, Wp = H + 2, W + 2
    Lp = N * Hp * Wp
    j = np.arange(L)
    r = j % (Hp * Wp)
    hh, ww = r // Wp, r % Wp
    ok = (j < Lp) & (hh >= 1) & (hh <= H) & (ww >= 1) & (ww <= W)
    return jnp.asarray(ok.astype(np.float32)[None, :])            # (1, L)


def _pack_conv_weight(w, C, CP):
    # OIHW (C, C, 3, 3) -> (CP, 9*CP) bf16 with column index (kh*3+kw)*CP + ci,
    # zero-padded to the 8-sublane tile.
    wp = jnp.zeros((CP, CP, 3, 3), jnp.float32).at[:C, :C].set(w.astype(jnp.float32))
    return jnp.transpose(wp, (0, 2, 3, 1)).reshape(CP, 9 * CP).astype(jnp.bfloat16)


def _pack_bn_param(p, C, CP):
    return jnp.zeros((CP, 1), jnp.float32).at[:C, 0].set(p.astype(jnp.float32))


def basic_block_forward(x_nchw, params):
    """PyTorch-equivalent BasicBlock forward (stride=1, no downsample),
    BatchNorm in training mode (per-batch stats, biased variance, eps=1e-5)."""
    w1, w2, g1, b1, g2, b2 = params
    x = x_nchw.astype(jnp.float32)
    N, C, H, W = x.shape
    Hp, Wp = H + 2, W + 2                # per-image physical zero halo
    assert _MARGIN >= Wp + 1
    CP = _round_up(C, 8)                 # sublane-tile channel pad (no-op if C%8==0)
    Lp = N * Hp * Wp
    L = _round_up(Lp, 128)               # lane-aligned flat domain
    n_valid = N * H * W

    # channel-major + zero halo + lane-aligned margins: (CP, L + 2*margin) f32
    xp = jnp.pad(jnp.transpose(x, (1, 0, 2, 3)),
                 ((0, CP - C), (0, 0), (1, 1), (1, 1)))
    x_ext = jnp.pad(xp.reshape(CP, Lp),
                    ((0, 0), (_MARGIN, _MARGIN + (L - Lp))))
    # TODO(synk): at real ResNet sizes, skip these wrapper HBM passes by reading
    # NCHW directly through a BlockSpec index_map over (N, spatial tiles) and
    # building the zero halo in a pre-zeroed VMEM scratch inside the kernel.

    vm = _valid_mask(N, H, W, L)
    w1m = _pack_conv_weight(w1, C, CP)
    w2m = _pack_conv_weight(w2, C, CP)
    g1p, b1p = _pack_bn_param(g1, C, CP), _pack_bn_param(b1, C, CP)
    g2p, b2p = _pack_bn_param(g2, C, CP), _pack_bn_param(b2, C, CP)

    def full(shape):
        zero = (0,) * len(shape)
        return pl.BlockSpec(shape, lambda i, zero=zero: zero)

    flops = 2 * 2 * CP * (9 * CP) * L + 30 * CP * L
    bytes_accessed = (4 * (x_ext.size + vm.size + 4 * CP + CP * L)
                      + 2 * (w1m.size + w2m.size))

    kernel = _make_kernel(CP, Wp, L, _MARGIN, n_valid)
    out2d = pl.pallas_call(
        kernel,
        out_shape=jax.ShapeDtypeStruct((CP, L), jnp.float32),
        grid=(1,),
        in_specs=[full(x_ext.shape), full(vm.shape), full(w1m.shape),
                  full(w2m.shape), full(g1p.shape), full(b1p.shape),
                  full(g2p.shape), full(b2p.shape)],
        out_specs=full((CP, L)),
        compiler_params=pltpu.CompilerParams(
            dimension_semantics=("parallel",)),
        cost_estimate=pl.CostEstimate(flops=flops, transcendentals=2 * CP,
                                      bytes_accessed=bytes_accessed),
    )(x_ext, vm, w1m, w2m, g1p, b1p, g2p, b2p)
    # TODO(synk): for real ResNet shapes, tile the flat spatial axis with a
    # 2*margin halo over a "parallel" grid axis (feeds both v7x TensorCores),
    # keep weight/BN specs constant-index (VMEM-resident) with pl.Buffered(2)
    # only on the streamed activation tiles, and size the live set against
    # v7x's 64 MiB (32 MiB scoped default) / v5e's 16 MiB scoped default via
    # pltpu.CompilerParams(vmem_limit_bytes=...).

    out = out2d[:C, :Lp].reshape(C, N, Hp, Wp)[:, :, 1:H + 1, 1:W + 1]
    return jnp.transpose(out, (1, 0, 2, 3))


def reference_forward(x_nchw, params):
    """Plain-JAX reference with identical semantics (training-mode BN)."""
    w1, w2, g1, b1, g2, b2 = params
    x = x_nchw.astype(jnp.float32)
    dn = ('NCHW', 'OIHW', 'NCHW')

    def bn(o, g, b):
        m = jnp.mean(o, axis=(0, 2, 3), keepdims=True)
        v = jnp.mean((o - m) ** 2, axis=(0, 2, 3), keepdims=True)
        return ((o - m) / jnp.sqrt(v + _EPS) * g.reshape(1, -1, 1, 1)
                + b.reshape(1, -1, 1, 1))

    conv = functools.partial(lax.conv_general_dilated, window_strides=(1, 1),
                             padding='SAME', dimension_numbers=dn,
                             precision=lax.Precision.HIGHEST)
    o = jax.nn.relu(bn(conv(x, w1), g1, b1))
    o = jax.nn.relu(bn(conv(o, w2), g2, b2) + x)
    return o


if __name__ == "__main__":
    N, C, H, W = 2, 4, 16, 16                 # inplanes = planes = 4, stride = 1
    key = jax.random.PRNGKey(0)
    kx, k1, k2 = jax.random.split(key, 3)
    x = jax.random.normal(kx, (N, C, H, W), dtype=jnp.float32)
    # conv3x3 weights (OIHW, bias=False), deterministic init
    w1 = 0.3 * jax.random.normal(k1, (C, C, 3, 3), dtype=jnp.float32)
    w2 = 0.3 * jax.random.normal(k2, (C, C, 3, 3), dtype=jnp.float32)
    # BatchNorm affine params, deterministic non-trivial init
    g1 = 1.0 + 0.10 * jnp.arange(C, dtype=jnp.float32)
    b1 = 0.05 * jnp.arange(C, dtype=jnp.float32) - 0.10
    g2 = 1.0 - 0.05 * jnp.arange(C, dtype=jnp.float32)
    b2 = 0.02 * jnp.arange(C, dtype=jnp.float32)
    params = (w1, w2, g1, b1, g2, b2)

    out = jax.block_until_ready(basic_block_forward(x, params))
    ref = jax.block_until_ready(reference_forward(x, params))
    assert out.shape == (N, C, H, W)
    # bf16 MXU operands (f32 accumulation) vs the f32 HIGHEST-precision
    # reference: tolerance relaxed accordingly (per review's correctness note).
    np.testing.assert_allclose(np.asarray(out), np.asarray(ref),
                               rtol=3e-2, atol=3e-2)
    print("KERNEL_OK")
</pallas_src>

<mosaic_0001>
module attributes {stable_mosaic.version = 11 : i64} {
  func.func @kernel(%arg0: i32, %arg1: memref<8x1024xf32, #tpu.memory_space<vmem>>, %arg2: memref<1x768xf32, #tpu.memory_space<vmem>>, %arg3: memref<8x72xbf16, #tpu.memory_space<vmem>>, %arg4: memref<8x72xbf16, #tpu.memory_space<vmem>>, %arg5: memref<8x1xf32, #tpu.memory_space<vmem>>, %arg6: memref<8x1xf32, #tpu.memory_space<vmem>>, %arg7: memref<8x1xf32, #tpu.memory_space<vmem>>, %arg8: memref<8x1xf32, #tpu.memory_space<vmem>>, %arg9: memref<8x768xf32, #tpu.memory_space<vmem>>) attributes {dimension_semantics = [#tpu.dimension_semantics<parallel>], iteration_bounds = array<i64: 1>, scalar_prefetch = 0 : i64, scratch_operands = 0 : i64, tpu.core_type = #tpu.core_type<tc>, window_params = [{pipeline_mode = #tpu.pipeline_mode<synchronous>, transform_indices = @transform_0, window_bounds = array<i64: 8, 1024>}, {pipeline_mode = #tpu.pipeline_mode<synchronous>, transform_indices = @transform_1, window_bounds = array<i64: 1, 768>}, {pipeline_mode = #tpu.pipeline_mode<synchronous>, transform_indices = @transform_2, window_bounds = array<i64: 8, 72>}, {pipeline_mode = #tpu.pipeline_mode<synchronous>, transform_indices = @transform_3, window_bounds = array<i64: 8, 72>}, {pipeline_mode = #tpu.pipeline_mode<synchronous>, transform_indices = @transform_4, window_bounds = array<i64: 8, 1>}, {pipeline_mode = #tpu.pipeline_mode<synchronous>, transform_indices = @transform_5, window_bounds = array<i64: 8, 1>}, {pipeline_mode = #tpu.pipeline_mode<synchronous>, transform_indices = @transform_6, window_bounds = array<i64: 8, 1>}, {pipeline_mode = #tpu.pipeline_mode<synchronous>, transform_indices = @transform_7, window_bounds = array<i64: 8, 1>}, {pipeline_mode = #tpu.pipeline_mode<synchronous>, transform_indices = @transform_8, window_bounds = array<i64: 8, 768>}]} {
    %c0 = arith.constant 0 : index
    %c0_0 = arith.constant 0 : index
    %0 = vector.load %arg1[%c0, %c0_0] : memref<8x1024xf32, #tpu.memory_space<vmem>>, vector<8x1024xf32>
    %c0_1 = arith.constant 0 : index
    %c0_2 = arith.constant 0 : index
    %1 = vector.load %arg2[%c0_1, %c0_2] : memref<1x768xf32, #tpu.memory_space<vmem>>, vector<1x768xf32>
    %c0_3 = arith.constant 0 : index
    %c0_4 = arith.constant 0 : index
    %2 = vector.load %arg3[%c0_3, %c0_4] : memref<8x72xbf16, #tpu.memory_space<vmem>>, vector<8x72xbf16>
    %3 = vector.extract_strided_slice %0 {offsets = [0, 109], sizes = [8, 768], strides = [1, 1]} : vector<8x1024xf32> to vector<8x768xf32>
    %4 = vector.extract_strided_slice %0 {offsets = [0, 110], sizes = [8, 768], strides = [1, 1]} : vector<8x1024xf32> to vector<8x768xf32>
    %5 = vector.extract_strided_slice %0 {offsets = [0, 111], sizes = [8, 768], strides = [1, 1]} : vector<8x1024xf32> to vector<8x768xf32>
    %6 = vector.extract_strided_slice %0 {offsets = [0, 127], sizes = [8, 768], strides = [1, 1]} : vector<8x1024xf32> to vector<8x768xf32>
    %7 = vector.extract_strided_slice %0 {offsets = [0, 128], sizes = [8, 768], strides = [1, 1]} : vector<8x1024xf32> to vector<8x768xf32>
    %8 = vector.extract_strided_slice %0 {offsets = [0, 129], sizes = [8, 768], strides = [1, 1]} : vector<8x1024xf32> to vector<8x768xf32>
    %9 = vector.extract_strided_slice %0 {offsets = [0, 145], sizes = [8, 768], strides = [1, 1]} : vector<8x1024xf32> to vector<8x768xf32>
    %10 = vector.extract_strided_slice %0 {offsets = [0, 146], sizes = [8, 768], strides = [1, 1]} : vector<8x1024xf32> to vector<8x768xf32>
    %11 = vector.extract_strided_slice %0 {offsets = [0, 147], sizes = [8, 768], strides = [1, 1]} : vector<8x1024xf32> to vector<8x768xf32>
    %12 = tpu.concatenate %3, %4, %5, %6, %7, %8, %9, %10, %11 in 0 : vector<8x768xf32>, vector<8x768xf32>, vector<8x768xf32>, vector<8x768xf32>, vector<8x768xf32>, vector<8x768xf32>, vector<8x768xf32>, vector<8x768xf32>, vector<8x768xf32> -> vector<72x768xf32>
    %13 = arith.truncf %12 : vector<72x768xf32> to vector<72x768xbf16>
    %cst = arith.constant dense<0.000000e+00> : vector<8x768xf32>
    %14 = tpu.matmul %2, %13, %cst {dimension_numbers = #tpu.dot_dimension_numbers<[1], [0], [0], [1], [0, 0, 1, 1], [], []>} : vector<8x72xbf16>, vector<72x768xbf16>, vector<8x768xf32> -> vector<8x768xf32>
    %c0_5 = arith.constant 0 : index
    %c0_6 = arith.constant 0 : index
    %15 = vector.load %arg5[%c0_5, %c0_6] : memref<8x1xf32, #tpu.memory_space<vmem>>, vector<8x1xf32>
    %c0_7 = arith.constant 0 : index
    %c0_8 = arith.constant 0 : index
    %16 = vector.load %arg6[%c0_7, %c0_8] : memref<8x1xf32, #tpu.memory_space<vmem>>, vector<8x1xf32>
    %17 = vector.broadcast %1 : vector<1x768xf32> to vector<8x768xf32>
    %18 = arith.mulf %14, %17 : vector<8x768xf32>
    %cst_9 = arith.constant dense<0.000000e+00> : vector<8xf32>
    %19 = vector.multi_reduction <add>, %18, %cst_9 [1] : vector<8x768xf32> to vector<8xf32>
    %20 = vector.shape_cast %19 : vector<8xf32> to vector<8x1xf32>
    %cst_10 = arith.constant 0.001953125 : f32
    %21 = vector.broadcast %cst_10 : f32 to vector<8x1xf32>
    %22 = arith.mulf %20, %21 : vector<8x1xf32>
    %23 = arith.mulf %18, %18 : vector<8x768xf32>
    %cst_11 = arith.constant dense<0.000000e+00> : vector<8xf32>
    %24 = vector.multi_reduction <add>, %23, %cst_11 [1] : vector<8x768xf32> to vector<8xf32>
    %25 = vector.shape_cast %24 : vector<8xf32> to vector<8x1xf32>
    %cst_12 = arith.constant 0.001953125 : f32
    %26 = vector.broadcast %cst_12 : f32 to vector<8x1xf32>
    %27 = arith.mulf %25, %26 : vector<8x1xf32>
    %28 = arith.mulf %22, %22 : vector<8x1xf32>
    %29 = arith.subf %27, %28 : vector<8x1xf32>
    %cst_13 = arith.constant 9.99999974E-6 : f32
    %30 = vector.broadcast %cst_13 : f32 to vector<8x1xf32>
    %31 = arith.addf %29, %30 : vector<8x1xf32>
    %32 = math.rsqrt %31 : vector<8x1xf32>
    %33 = arith.mulf %15, %32 : vector<8x1xf32>
    %34 = arith.mulf %22, %33 : vector<8x1xf32>
    %35 = arith.subf %16, %34 : vector<8x1xf32>
    %36 = vector.broadcast %33 : vector<8x1xf32> to vector<8x768xf32>
    %37 = arith.mulf %14, %36 : vector<8x768xf32>
    %38 = vector.broadcast %35 : vector<8x1xf32> to vector<8x768xf32>
    %39 = arith.addf %37, %38 : vector<8x768xf32>
    %cst_14 = arith.constant 0.000000e+00 : f32
    %40 = vector.broadcast %cst_14 : f32 to vector<8x768xf32>
    %41 = arith.maximumf %39, %40 : vector<8x768xf32>
    %42 = vector.broadcast %1 : vector<1x768xf32> to vector<8x768xf32>
    %43 = arith.mulf %41, %42 : vector<8x768xf32>
    %cst_15 = arith.constant 0.000000e+00 : f32
    %44 = vector.broadcast %cst_15 : f32 to vector<8x128xf32>
    %45 = tpu.concatenate %44, %43, %44 in 1 : vector<8x128xf32>, vector<8x768xf32>, vector<8x128xf32> -> vector<8x1024xf32>
    %c0_16 = arith.constant 0 : index
    %c0_17 = arith.constant 0 : index
    %46 = vector.load %arg4[%c0_16, %c0_17] : memref<8x72xbf16, #tpu.memory_space<vmem>>, vector<8x72xbf16>
    %47 = vector.extract_strided_slice %45 {offsets = [0, 109], sizes = [8, 768], strides = [1, 1]} : vector<8x1024xf32> to vector<8x768xf32>
    %48 = vector.extract_strided_slice %45 {offsets = [0, 110], sizes = [8, 768], strides = [1, 1]} : vector<8x1024xf32> to vector<8x768xf32>
    %49 = vector.extract_strided_slice %45 {offsets = [0, 111], sizes = [8, 768], strides = [1, 1]} : vector<8x1024xf32> to vector<8x768xf32>
    %50 = vector.extract_strided_slice %45 {offsets = [0, 127], sizes = [8, 768], strides = [1, 1]} : vector<8x1024xf32> to vector<8x768xf32>
    %51 = vector.extract_strided_slice %45 {offsets = [0, 128], sizes = [8, 768], strides = [1, 1]} : vector<8x1024xf32> to vector<8x768xf32>
    %52 = vector.extract_strided_slice %45 {offsets = [0, 129], sizes = [8, 768], strides = [1, 1]} : vector<8x1024xf32> to vector<8x768xf32>
    %53 = vector.extract_strided_slice %45 {offsets = [0, 145], sizes = [8, 768], strides = [1, 1]} : vector<8x1024xf32> to vector<8x768xf32>
    %54 = vector.extract_strided_slice %45 {offsets = [0, 146], sizes = [8, 768], strides = [1, 1]} : vector<8x1024xf32> to vector<8x768xf32>
    %55 = vector.extract_strided_slice %45 {offsets = [0, 147], sizes = [8, 768], strides = [1, 1]} : vector<8x1024xf32> to vector<8x768xf32>
    %56 = tpu.concatenate %47, %48, %49, %50, %51, %52, %53, %54, %55 in 0 : vector<8x768xf32>, vector<8x768xf32>, vector<8x768xf32>, vector<8x768xf32>, vector<8x768xf32>, vector<8x768xf32>, vector<8x768xf32>, vector<8x768xf32>, vector<8x768xf32> -> vector<72x768xf32>
    %57 = arith.truncf %56 : vector<72x768xf32> to vector<72x768xbf16>
    %cst_18 = arith.constant dense<0.000000e+00> : vector<8x768xf32>
    %58 = tpu.matmul %46, %57, %cst_18 {dimension_numbers = #tpu.dot_dimension_numbers<[1], [0], [0], [1], [0, 0, 1, 1], [], []>} : vector<8x72xbf16>, vector<72x768xbf16>, vector<8x768xf32> -> vector<8x768xf32>
    %c0_19 = arith.constant 0 : index
    %c0_20 = arith.constant 0 : index
    %59 = vector.load %arg7[%c0_19, %c0_20] : memref<8x1xf32, #tpu.memory_space<vmem>>, vector<8x1xf32>
    %c0_21 = arith.constant 0 : index
    %c0_22 = arith.constant 0 : index
    %60 = vector.load %arg8[%c0_21, %c0_22] : memref<8x1xf32, #tpu.memory_space<vmem>>, vector<8x1xf32>
    %61 = vector.broadcast %1 : vector<1x768xf32> to vector<8x768xf32>
    %62 = arith.mulf %58, %61 : vector<8x768xf32>
    %cst_23 = arith.constant dense<0.000000e+00> : vector<8xf32>
    %63 = vector.multi_reduction <add>, %62, %cst_23 [1] : vector<8x768xf32> to vector<8xf32>
    %64 = vector.shape_cast %63 : vector<8xf32> to vector<8x1xf32>
    %cst_24 = arith.constant 0.001953125 : f32
    %65 = vector.broadcast %cst_24 : f32 to vector<8x1xf32>
    %66 = arith.mulf %64, %65 : vector<8x1xf32>
    %67 = arith.mulf %62, %62 : vector<8x768xf32>
    %cst_25 = arith.constant dense<0.000000e+00> : vector<8xf32>
    %68 = vector.multi_reduction <add>, %67, %cst_25 [1] : vector<8x768xf32> to vector<8xf32>
    %69 = vector.shape_cast %68 : vector<8xf32> to vector<8x1xf32>
    %cst_26 = arith.constant 0.001953125 : f32
    %70 = vector.broadcast %cst_26 : f32 to vector<8x1xf32>
    %71 = arith.mulf %69, %70 : vector<8x1xf32>
    %72 = arith.mulf %66, %66 : vector<8x1xf32>
    %73 = arith.subf %71, %72 : vector<8x1xf32>
    %cst_27 = arith.constant 9.99999974E-6 : f32
    %74 = vector.broadcast %cst_27 : f32 to vector<8x1xf32>
    %75 = arith.addf %73, %74 : vector<8x1xf32>
    %76 = math.rsqrt %75 : vector<8x1xf32>
    %77 = arith.mulf %59, %76 : vector<8x1xf32>
    %78 = arith.mulf %66, %77 : vector<8x1xf32>
    %79 = arith.subf %60, %78 : vector<8x1xf32>
    %80 = vector.broadcast %77 : vector<8x1xf32> to vector<8x768xf32>
    %81 = arith.mulf %58, %80 : vector<8x768xf32>
    %82 = vector.broadcast %79 : vector<8x1xf32> to vector<8x768xf32>
    %83 = arith.addf %81, %82 : vector<8x768xf32>
    %84 = vector.extract_strided_slice %0 {offsets = [0, 128], sizes = [8, 768], strides = [1, 1]} : vector<8x1024xf32> to vector<8x768xf32>
    %85 = arith.addf %83, %84 : vector<8x768xf32>
    %cst_28 = arith.constant 0.000000e+00 : f32
    %86 = vector.broadcast %cst_28 : f32 to vector<8x768xf32>
    %87 = arith.maximumf %85, %86 : vector<8x768xf32>
    %c0_29 = arith.constant 0 : index
    %c0_30 = arith.constant 0 : index
    %88 = vector.load %arg9[%c0_29, %c0_30] : memref<8x768xf32, #tpu.memory_space<vmem>>, vector<8x768xf32>
    tpu.vector_store %arg9[%c0_29, %c0_30], %87 {strides = array<i32>} : memref<8x768xf32, #tpu.memory_space<vmem>>, vector<8x768xf32>,
    return
  }
  func.func @transform_0(%arg0: i32) -> (i32, i32) {
    %c0_i32 = arith.constant 0 : i32
    %c0_i32_0 = arith.constant 0 : i32
    %c0_i32_1 = arith.constant 0 : i32
    return %c0_i32, %c0_i32_0 : i32, i32
  }
  func.func @transform_1(%arg0: i32) -> (i32, i32) {
    %c0_i32 = arith.constant 0 : i32
    %c0_i32_0 = arith.constant 0 : i32
    %c0_i32_1 = arith.constant 0 : i32
    return %c0_i32, %c0_i32_0 : i32, i32
  }
  func.func @transform_2(%arg0: i32) -> (i32, i32) {
    %c0_i32 = arith.constant 0 : i32
    %c0_i32_0 = arith.constant 0 : i32
    %c0_i32_1 = arith.constant 0 : i32
    return %c0_i32, %c0_i32_0 : i32, i32
  }
  func.func @transform_3(%arg0: i32) -> (i32, i32) {
    %c0_i32 = arith.constant 0 : i32
    %c0_i32_0 = arith.constant 0 : i32
    %c0_i32_1 = arith.constant 0 : i32
    return %c0_i32, %c0_i32_0 : i32, i32
  }
  func.func @transform_4(%arg0: i32) -> (i32, i32) {
    %c0_i32 = arith.constant 0 : i32
    %c0_i32_0 = arith.constant 0 : i32
    %c0_i32_1 = arith.constant 0 : i32
    return %c0_i32, %c0_i32_0 : i32, i32
  }
  func.func @transform_5(%arg0: i32) -> (i32, i32) {
    %c0_i32 = arith.constant 0 : i32
    %c0_i32_0 = arith.constant 0 : i32
    %c0_i32_1 = arith.constant 0 : i32
    return %c0_i32, %c0_i32_0 : i32, i32
  }
  func.func @transform_6(%arg0: i32) -> (i32, i32) {
    %c0_i32 = arith.constant 0 : i32
    %c0_i32_0 = arith.constant 0 : i32
    %c0_i32_1 = arith.constant 0 : i32
    return %c0_i32, %c0_i32_0 : i32, i32
  }
  func.func @transform_7(%arg0: i32) -> (i32, i32) {
    %c0_i32 = arith.constant 0 : i32
    %c0_i32_0 = arith.constant 0 : i32
    %c0_i32_1 = arith.constant 0 : i32
    return %c0_i32, %c0_i32_0 : i32, i32
  }
  func.func @transform_8(%arg0: i32) -> (i32, i32) {
    %c0_i32 = arith.constant 0 : i32
    %c0_i32_0 = arith.constant 0 : i32
    %c0_i32_1 = arith.constant 0 : i32
    return %c0_i32, %c0_i32_0 : i32, i32
  }
}

</mosaic_0001>

<bundles_post_ra>
// kernel: tpu_custom_call.1
= control target key start
LH: loop header
LB: loop body
LE: loop exit
PB: predicated region body
PF: predicated region fallthrough
CT: control target
= control target key end

     0   :  { %13 = vsyncpa [#allocation3], 0  ;;  %s2588_s0 = inlined_call_operand.hbm [shape: f32[8,1024], index: 0, kind: input, shape index: {}]   ;;  %s2589_s1 = inlined_call_operand.vmem [shape: f32[1,768], index: 1, kind: input, shape index: {}]   ;;  %s2590_s2 = inlined_call_operand.vmem [shape: bf16[8,72], index: 2, kind: input, shape index: {}]   ;;  %s2591_s3 = inlined_call_operand.vmem [shape: bf16[8,72], index: 3, kind: input, shape index: {}]   ;;  %s2592_s4 = inlined_call_operand.vmem [shape: f32[8,1], index: 4, kind: input, shape index: {}]   ;;  %s2593_s5 = inlined_call_operand.vmem [shape: f32[8,1], index: 5, kind: input, shape index: {}]   ;;  %s2594_s6 = inlined_call_operand.vmem [shape: f32[8,1], index: 6, kind: input, shape index: {}]   ;;  %s2595_s7 = inlined_call_operand.vmem [shape: f32[8,1], index: 7, kind: input, shape index: {}]   ;;  %s2596_s8 = inlined_call_operand.hbm [shape: f32[8,768], index: 8, kind: output, shape index: {}]  }
   0x1   :  { %14 = vsyncpa [#allocation4], 0  ;;  %s1701_s27 = smov [#allocation2]   ;;  %s1653_s9 = scalar_lea.hbm %s2588_s0, 1024 }
   0x2   :  { %s21_s28 = sshll.u32 %s1701_s27, 4  ;;  %p1654_p0 = scmp.ne.s32.totalorder %s2588_s0, %s1653_s9  ;;  %s22_s28 = int_to_ptr.vmem [resolvable:$true] %s21_s28 }
   0x3   :  { %p1657_p1 = scmp.lt.u32.totalorder %s1653_s9, %s2588_s0 }
   0x5   :  { %p1659_p2 = pnand %p1657_p1, %p1654_p0 }
   0x7   :  { %1662 = shalt.err (!%p1659_p2)
}
   0x8   :  { %s1663_s14 = scalar_lea.vmem %s22_s28, 1024  ;;  %p1668_p4 = scmp.lt.s32.totalorder %s22_s28, %s22_s28 }
   0x9   :  { %p1664_p3 = scmp.ne.s32.totalorder %s22_s28, %s1663_s14  ;;  %p1669_p5 = scmp.lt.s32.totalorder %s1663_s14, %s1663_s14 }
   0xb   :  { %p1670_p6 = por %p1669_p5, %p1668_p4 }
   0xd   :  { %p1671_p7 = pnand %p1670_p6, %p1664_p3 }
   0xf   :  { %1674 = shalt.err (!%p1671_p7)
}
  0x10   :  { %24 = dma.hbm_to_vmem [thread:$0]  %s2588_s0, 1024, %s22_s28, [#allocation3]  }
  0x11   :  { %1697 = dma.done.wait [#allocation3], 1024  }
  0x12   :  { %1698 = vsyncadd [#allocation3], 4294966272  ;;  %v1771_v0 = vld [vmem:[#allocation2 + $0x8] sm:$0xff]  ;;  %v1773_v1 = vld [vmem:[#allocation2 + $0x10] sm:$0xff]  ;;  %s1702_s17 = smov 126   ;;  %s1703_s18 = smov 127  }
  0x13   :  { %v1775_v2 = vld [vmem:[#allocation2] sm:$0xff]  ;;  %v1411_v3 = vpack.i.bf16 %v1773_v1, %v1771_v0  ;;  %v1779_v4 = vld [vmem:[#allocation2 + $0x18] sm:$0xff]  ;;  %s1704_s0 = smov 110   ;;  %s1705_s19 = smov 109   ;;  %v1799_v8 = vld [vmem:[#allocation2 + $0x28] sm:$0xff]  ;;  %vm74_vm0 = vcmask 1039360  }
  0x14   :  { %v1416_v5 = vpack.i.bf16 %v1775_v2, %v1779_v4  ;;  %v1787_v6 = vld [vmem:[#allocation2 + $0x20] sm:$0xff]  ;;  %s1706_s20 = smov 108   ;;  %s1707_s21 = smov 92   ;;  %v1807_v10 = vld [vmem:[#allocation2 + $0x30] sm:$0xff]  ;;  %v50_v12 = vld [vmem:[#allocation2 + $0x38] sm:$0xff]  ;;  %vm130_vm1 = vcmask 900096  }
  0x15   :  { %1412 = vrot.lane.b32.xlu1 %v1411_v3, %s1702_s17  ;;  %1402 = vrot.lane.b32.xlu0 %v1411_v3, %s1703_s18  ;;  %v1436_v7 = vpack.i.bf16 %v1787_v6, %v1779_v4  ;;  %s1708_s22 = smov 91   ;;  %v1471_v9 = vpack.i.bf16 %v1799_v8, %v1787_v6  ;;  %s1709_s23 = smov 90   ;;  %v1496_v11 = vpack.i.bf16 %v1807_v10, %v1799_v8  ;;  %vm102_vm2 = vcmask 1031168  }
  0x16   :  { %v1516_v13 = vpack.i.bf16 %v50_v12, %v1807_v10  ;;  %s1710_s24 = smov 19   ;;  %vm184_vm3 = vcmask 883712   ;;  %vm156_vm4 = vcmask 891904   ;;  %vm240_vm5 = vcmask 744448  }
  0x17   :  { %vm212_vm6 = vcmask 752640   ;;  %vm268_vm7 = vcmask 736256   ;;  %vm422_vm8 = vcmask 154624   ;;  %vm481_vm9 = vcmask 1043456  }
  0x18   :  { %vm477_vm10 = vcmask 588800  }
  0x19   :  { %1417 = vrot.lane.b32.xlu1 %v1416_v5, %s1702_s17  ;;  %1407 = vrot.lane.b32.xlu0 %v1416_v5, %s1703_s18 }
  0x1d   :  { %1427 = vrot.lane.b32.xlu1 %v1416_v5, %s1704_s0  ;;  %1422 = vrot.lane.b32.xlu0 %v1411_v3, %s1704_s0 }
  0x21   :  { %1437 = vrot.lane.b32.xlu1 %v1436_v7, %s1705_s19  ;;  %1432 = vrot.lane.b32.xlu0 %v1411_v3, %s1705_s19 }
  0x25   :  { %1447 = vrot.lane.b32.xlu1 %v1436_v7, %s1706_s20  ;;  %1442 = vrot.lane.b32.xlu0 %v1411_v3, %s1706_s20 }
  0x29   :  { %1457 = vrot.lane.b32.xlu1 %v1436_v7, %s1707_s21  ;;  %1452 = vrot.lane.b32.xlu0 %v1411_v3, %s1707_s21 }
  0x2d   :  { %1467 = vrot.lane.b32.xlu1 %v1436_v7, %s1708_s22  ;;  %1462 = vrot.lane.b32.xlu0 %v1411_v3, %s1708_s22 }
  0x31   :  { %1477 = vrot.lane.b32.xlu1 %v1411_v3, %s1709_s23  ;;  %1472 = vrot.lane.b32.xlu0 %v1471_v9, %s1703_s18 }
  0x35   :  { %72 = vrot.lane.b32.xlu1 %v1807_v10, %s1703_s18  ;;  %258 = vrot.lane.b32.xlu0 %v1779_v4, %s1709_s23 }
  0x39   :  { %1487 = vrot.lane.b32.xlu1 %v1471_v9, %s1704_s0  ;;  %1482 = vrot.lane.b32.xlu0 %v1471_v9, %s1702_s17 }
  0x3d   :  { %128 = vrot.lane.b32.xlu1 %v1807_v10, %s1704_s0  ;;  %100 = vrot.lane.b32.xlu0 %v1807_v10, %s1702_s17 }
  0x41   :  { %1497 = vrot.lane.b32.xlu1 %v1496_v11, %s1706_s20  ;;  %1492 = vrot.lane.b32.xlu0 %v1496_v11, %s1705_s19 }
  0x45   :  { %1502 = vrot.lane.b32.xlu1 %v1496_v11, %s1707_s21  ;;  %182 = vrot.lane.b32.xlu0 %v50_v12, %s1706_s20 }
  0x49   :  { %210 = vrot.lane.b32.xlu1 %v50_v12, %s1707_s21  ;;  %1507 = vrot.lane.b32.xlu0 %v1496_v11, %s1708_s22 }
  0x4d   :  { %1512 = vrot.lane.b32.xlu1 %v1471_v9, %s1709_s23  ;;  %238 = vrot.lane.b32.xlu0 %v50_v12, %s1708_s22 }
  0x51   :  { %1517 = vrot.lane.b32.xlu0 %v1516_v13, %s1709_s23 }
  0x87   :  { %v1831_v14 = vpop.permute.xlu1 %1412  ;;  %v1833_v15 = vpop.permute.xlu0 %1402 }
  0x88   :  { %v1405_v34 = vunpack.i.h.bf16 %v1833_v15  ;;  %v1415_v42 = vunpack.i.h.bf16 %v1831_v14  ;;  %v1414_v43 = vunpack.i.l.bf16 %v1831_v14  ;;  %v1404_v59 = vunpack.i.l.bf16 %v1833_v15 }
  0x8a   :  { %v104_v51 = vsel %vm102_vm2, %v1414_v43, %v1415_v42  ;;  %v76_v13 = vsel %vm74_vm0, %v1404_v59, %v1405_v34 }
  0x8b   :  { %v1835_v16 = vpop.permute.xlu1 %1417  ;;  %v1837_v17 = vpop.permute.xlu0 %1407 }
  0x8c   :  { %v1409_v29 = vunpack.i.l.bf16 %v1837_v17  ;;  %v1420_v50 = vunpack.i.h.bf16 %v1835_v16 }
  0x8e   :  { %v77_v40 = vsel %vm74_vm0, %v1405_v34, %v1409_v29  ;;  %v103_v62 = vsel %vm102_vm2, %v1420_v50, %v1414_v43 }
  0x8f   :  { %v1839_v18 = vpop.permute.xlu1 %1427  ;;  %v1841_v19 = vpop.permute.xlu0 %1422  ;;  %v284_v45 = vpack.c.bf16 %v77_v40, %v1773_v1 }
  0x90   :  { %v1425_v36 = vunpack.i.h.bf16 %v1841_v19  ;;  %v1424_v37 = vunpack.i.l.bf16 %v1841_v19  ;;  %v1430_v46 = vunpack.i.h.bf16 %v1839_v18  ;;  %v1429_v40 = vunpack.i.l.bf16 %v1839_v18 }
  0x92   :  { %v132_v49 = vsel %vm130_vm1, %v1424_v37, %v1425_v36  ;;  %v131_v58 = vsel %vm130_vm1, %v1430_v46, %v1424_v37  ;;  %v283_v37 = vpack.c.bf16 %v76_v13, %v1771_v0  ;;  %v133_v18 = vsel %vm130_vm1, %v1425_v36, %v1429_v40 }
  0x93   :  { %v1843_v20 = vpop.permute.xlu1 %1437  ;;  %v1845_v21 = vpop.permute.xlu0 %1432  ;;  %v290_v53 = vpack.c.bf16 %v132_v49, %v104_v51  ;;  %v289_v63 = vpack.c.bf16 %v131_v58, %v103_v62 }
  0x94   :  { %v1434_v24 = vunpack.i.l.bf16 %v1845_v21  ;;  %v1439_v60 = vunpack.i.l.bf16 %v1843_v20  ;;  %v1435_v61 = vunpack.i.h.bf16 %v1845_v21 }
  0x96   :  { %v158_v12 = vsel %vm156_vm4, %v1435_v61, %v1439_v60 }
  0x97   :  { %v1847_v22 = vpop.permute.xlu1 %1447  ;;  %v1849_v23 = vpop.permute.xlu0 %1442 }
  0x98   :  { %v1444_v25 = vunpack.i.l.bf16 %v1849_v23  ;;  %v1449_v54 = vunpack.i.l.bf16 %v1847_v22  ;;  %v1445_v55 = vunpack.i.h.bf16 %v1849_v23 }
  0x9a   :  { %v296_v26 = vpack.c.bf16 %v1444_v25, %v1434_v24  ;;  %v186_v7 = vsel %vm184_vm3, %v1445_v55, %v1449_v54  ;;  %v185_v19 = vsel %vm184_vm3, %v1444_v25, %v1445_v55 }
  0x9b   :  { %v1857_v27 = vpop.permute.xlu1 %1457  ;;  %v1859_v28 = vpop.permute.xlu0 %1452  ;;  %v298_v15 = vpack.c.bf16 %v186_v7, %v158_v12 }
  0x9c   :  { %380 = vrot.lane.b32.xlu1 %v296_v26, %s1710_s24  ;;  %v1454_v32 = vunpack.i.l.bf16 %v1859_v28  ;;  %v1455_v11 = vunpack.i.h.bf16 %v1859_v28  ;;  %v1459_v14 = vunpack.i.l.bf16 %v1857_v27 }
  0x9e   :  { %v213_v34 = vsel %vm212_vm6, %v1454_v32, %v1455_v11 }
  0x9f   :  { %v1863_v30 = vpop.permute.xlu1 %1467  ;;  %v1865_v31 = vpop.permute.xlu0 %1462 }
  0xa0   :  { %v1464_v33 = vunpack.i.l.bf16 %v1865_v31  ;;  %v1465_v1 = vunpack.i.h.bf16 %v1865_v31 }
  0xa2   :  { %v303_v35 = vpack.c.bf16 %v1464_v33, %v1454_v32 }
  0xa3   :  { %v1874_v38 = vpop.permute.xlu1 %1477  ;;  %v1876_v39 = vpop.permute.xlu0 %1472 }
  0xa4   :  { %v1882_v41 = vunpack.i.l.bf16 %v1874_v38  ;;  %394 = vrot.lane.b32.xlu0 %v303_v35, %s1710_s24  ;;  %v1475_v26 = vunpack.i.h.bf16 %v1876_v39  ;;  %v1474_v31 = vunpack.i.l.bf16 %v1876_v39  ;;  %v241_v35 = vsel %vm240_vm5, %v1464_v33, %v1465_v1 }
  0xa5   :  { %v1480_v39 = vunpack.i.h.bf16 %v1874_v38 }
  0xa6   :  { %v310_v44 = vpack.c.bf16 %v1882_v41, %v1882_v41  ;;  %v79_v33 = vsel %vm74_vm0, %v1474_v31, %v1475_v26  ;;  %v78_v58 = vsel %vm74_vm0, %v1409_v29, %v1474_v31 }
  0xa7   :  { %v1891_v47 = vpop.permute.xlu1 %72  ;;  %v1893_v48 = vpop.permute.xlu0 %258  ;;  %v286_v28 = vpack.c.bf16 %v79_v33, %v1787_v6  ;;  %v269_v32 = vsel %vm268_vm7, %v1882_v41, %v1480_v39  ;;  %v157_v6 = vsel %vm156_vm4, %v1434_v24, %v1435_v61  ;;  %v1450_v61 = vunpack.i.h.bf16 %v1847_v22 }
  0xa8   :  { %408 = vrot.lane.b32.xlu1 %v310_v44, %s1710_s24  ;;  %356 = vrot.lane.b32.xlu0 %v284_v45, %s1710_s24  ;;  %v288_v52 = vpack.c.bf16 %v1891_v47, %v1807_v10  ;;  %v1410_v10 = vunpack.i.h.bf16 %v1837_v17  ;;  %v304_v44 = vpack.c.bf16 %v241_v35, %v213_v34  ;;  %v1419_v45 = vunpack.i.l.bf16 %v1835_v16 }
  0xa9   :  { %v311_v36 = vpack.c.bf16 %v269_v32, %v269_v32  ;;  %v80_v41 = vsel %vm74_vm0, %v1475_v26, %v1891_v47  ;;  %v297_v23 = vpack.c.bf16 %v185_v19, %v157_v6  ;;  %v214_v47 = vsel %vm212_vm6, %v1455_v11, %v1459_v14 }
  0xaa   :  { %v75_v43 = vsel %vm74_vm0, %v1410_v10, %v1404_v59  ;;  %v105_v16 = vsel %vm102_vm2, %v1415_v42, %v1419_v45  ;;  %v287_v24 = vpack.c.bf16 %v80_v41, %v1799_v8  ;;  %v2597_v59 = vmov 0  }
  0xab   :  { %v1908_v56 = vpop.permute.xlu1 %1487  ;;  %v1910_v57 = vpop.permute.xlu0 %1482  ;;  %v282_v0 = vpack.c.bf16 %v75_v43, %v1775_v2  ;;  %v291_v38 = vpack.c.bf16 %v133_v18, %v105_v16  ;;  %v1469_v2 = vunpack.i.l.bf16 %v1863_v30  ;;  %532 = vmatprep.mubr.bf16.mxu0 %v2597_v59  ;;  %573 = vmatprep.mubr.bf16.mxu1 %v2597_v59  ;;  %v1440_v17 = vunpack.i.h.bf16 %v1843_v20 }
  0xac   :  { %364 = vrot.lane.b32.xlu1 %v288_v52, %s1710_s24  ;;  %368 = vrot.lane.b32.xlu0 %v290_v53, %s1710_s24  ;;  %v1489_v42 = vunpack.i.l.bf16 %v1908_v56  ;;  %v1484_v46 = vunpack.i.l.bf16 %v1910_v57  ;;  %v1490_v53 = vunpack.i.h.bf16 %v1908_v56  ;;  %v1485_v55 = vunpack.i.h.bf16 %v1910_v57 }
  0xad   :  { %v242_v25 = vsel %vm240_vm5, %v1465_v1, %v1469_v2  ;;  %1521 = vset.pattern.permute.xlu0 %v2597_v59  ;;  %1522 = vset.pattern.permute.xlu1 %v2597_v59  ;;  %v270_v1 = vsel %vm268_vm7, %v1480_v39, %v1893_v48  ;;  %v159_v12 = vsel %vm156_vm4, %v1439_v60, %v1440_v17 }
  0xae   :  { %v106_v50 = vsel %vm102_vm2, %v1419_v45, %v1484_v46  ;;  %v134_v51 = vsel %vm130_vm1, %v1429_v40, %v1489_v42  ;;  %v305_v52 = vpack.c.bf16 %v242_v25, %v214_v47  ;;  %v312_v11 = vpack.c.bf16 %v270_v1, %v270_v1 }
  0xaf   :  { %v1920_v3 = vpop.permute.xlu1 %128  ;;  %v1922_v5 = vpop.permute.xlu0 %100  ;;  %v292_v8 = vpack.c.bf16 %v134_v51, %v106_v50  ;;  %v107_v13 = vsel %vm102_vm2, %v1484_v46, %v1485_v55  ;;  %v1460_v40 = vunpack.i.h.bf16 %v1857_v27 }
  0xb0   :  { %v295_v9 = vpack.c.bf16 %v1920_v3, %v1922_v5  ;;  %366 = vrot.lane.b32.xlu0 %v289_v63, %s1710_s24  ;;  %v136_v62 = vsel %vm130_vm1, %v1490_v53, %v1920_v3  ;;  %v108_v56 = vsel %vm102_vm2, %v1485_v55, %v1922_v5  ;;  %v285_v63 = vpack.c.bf16 %v78_v58, %v1779_v4 }
  0xb1   :  { %v294_v7 = vpack.c.bf16 %v136_v62, %v108_v56  ;;  %v187_v4 = vsel %vm184_vm3, %v1449_v54, %v1450_v61  ;;  %v1470_v54 = vunpack.i.h.bf16 %v1863_v30 }
  0xb2   :  { %378 = vrot.lane.b32.xlu1 %v295_v9, %s1710_s24  ;;  %v299_v22 = vpack.c.bf16 %v187_v4, %v159_v12 }
  0xb3   :  { %v1981_v49 = vpop.permute.xlu1 %1497  ;;  %v1983_v21 = vpop.permute.xlu0 %1492  ;;  %v243_v18 = vsel %vm240_vm5, %v1469_v2, %v1470_v54 }
  0xb4   :  { %384 = vrot.lane.b32.xlu0 %v298_v15, %s1710_s24  ;;  %v1500_v3 = vunpack.i.h.bf16 %v1981_v49  ;;  %v1495_v5 = vunpack.i.h.bf16 %v1983_v21  ;;  %v1499_v9 = vunpack.i.l.bf16 %v1981_v49  ;;  %v1494_v10 = vunpack.i.l.bf16 %v1983_v21 }
  0xb5   :  { %v135_v15 = vsel %vm130_vm1, %v1489_v42, %v1490_v53 }
  0xb6   :  { %354 = vrot.lane.b32.xlu1 %v283_v37, %s1710_s24  ;;  %v161_v26 = vsel %vm156_vm4, %v1494_v10, %v1495_v5  ;;  %v189_v31 = vsel %vm184_vm3, %v1499_v9, %v1500_v3  ;;  %v293_v20 = vpack.c.bf16 %v135_v15, %v107_v13  ;;  %v188_v45 = vsel %vm184_vm3, %v1450_v61, %v1499_v9 }
  0xb7   :  { %v1503_v29 = vpop.permute.xlu1 %1502  ;;  %v183_v57 = vpop.permute.xlu0 %182  ;;  %v301_v60 = vpack.c.bf16 %v189_v31, %v161_v26 }
  0xb8   :  { %396 = vrot.lane.b32.xlu0 %v304_v44, %s1710_s24  ;;  %v1505_v34 = vunpack.i.h.bf16 %v1503_v29  ;;  %v160_v44 = vsel %vm156_vm4, %v1440_v17, %v1494_v10  ;;  %v1504_v33 = vunpack.i.l.bf16 %v1503_v29  ;;  %v190_v32 = vsel %vm184_vm3, %v1500_v3, %v183_v57 }
  0xb9   :  { %v300_v16 = vpack.c.bf16 %v188_v45, %v160_v44  ;;  %v302_v2 = vpack.c.bf16 %v190_v32, %v1495_v5  ;;  %v52_v32 = vld [vmem:[%s2590_s2] sm:$0xf] }
  0xba   :  { %352 = vrot.lane.b32.xlu1 %v282_v0, %s1710_s24  ;;  %v217_v19 = vsel %vm212_vm6, %v1504_v33, %v1505_v34  ;;  %v216_v27 = vsel %vm212_vm6, %v1460_v40, %v1504_v33 }
  0xbb   :  { %v211_v35 = vpop.permute.xlu1 %210  ;;  %v1508_v37 = vpop.permute.xlu0 %1507 }
  0xbc   :  { %360 = vrot.lane.b32.xlu0 %v286_v28, %s1710_s24  ;;  %v1510_v43 = vunpack.i.h.bf16 %v1508_v37  ;;  %v1509_v0 = vunpack.i.l.bf16 %v1508_v37  ;;  %v218_v21 = vsel %vm212_vm6, %v1505_v34, %v211_v35 }
  0xbe   :  { %370 = vrot.lane.b32.xlu1 %v291_v38, %s1710_s24  ;;  %v215_v38 = vsel %vm212_vm6, %v1459_v14, %v1460_v40 }
  0xbf   :  { %v239_v39 = vpop.permute.xlu0 %238  ;;  %v1513_v28 = vpop.permute.xlu1 %1512  ;;  %v306_v6 = vpack.c.bf16 %v243_v18, %v215_v38 }
  0xc0   :  { %410 = vrot.lane.b32.xlu0 %v311_v36, %s1710_s24  ;;  %v245_v36 = vsel %vm240_vm5, %v1509_v0, %v1510_v43  ;;  %v1514_v41 = vunpack.i.l.bf16 %v1513_v28  ;;  %v1515_v46 = vunpack.i.h.bf16 %v1513_v28 }
  0xc1   :  { %v308_v42 = vpack.c.bf16 %v245_v36, %v217_v19 }
  0xc2   :  { %382 = vrot.lane.b32.xlu1 %v297_v23, %s1710_s24  ;;  %v244_v23 = vsel %vm240_vm5, %v1470_v54, %v1509_v0  ;;  %v271_v14 = vsel %vm268_vm7, %v1893_v48, %v1514_v41 }
  0xc3   :  { %v1518_v30 = vpop.permute.xlu0 %1517  ;;  %v307_v49 = vpack.c.bf16 %v244_v23, %v216_v27  ;;  %v313_v50 = vpack.c.bf16 %v271_v14, %v271_v14 }
  0xc4   :  { %362 = vrot.lane.b32.xlu0 %v287_v24, %s1710_s24  ;;  %v1519_v25 = vunpack.i.l.bf16 %v1518_v30  ;;  %v246_v24 = vsel %vm240_vm5, %v1510_v43, %v239_v39  ;;  %v1520_v51 = vunpack.i.h.bf16 %v1518_v30 }
  0xc5   :  { %v309_v53 = vpack.c.bf16 %v246_v24, %v218_v21 }
  0xc6   :  { %398 = vrot.lane.b32.xlu1 %v305_v52, %s1710_s24  ;;  %v273_v47 = vsel %vm268_vm7, %v1515_v46, %v1519_v25  ;;  %v272_v52 = vsel %vm268_vm7, %v1514_v41, %v1515_v46  ;;  %v274_v58 = vsel %vm268_vm7, %v1519_v25, %v1520_v51 }
  0xc7   :  { %v315_v55 = vpack.c.bf16 %v273_v47, %v273_v47  ;;  %v314_v48 = vpack.c.bf16 %v272_v52, %v272_v52 }
  0xc8   :  { %372 = vrot.lane.b32.xlu0 %v292_v8, %s1710_s24  ;;  %v316_v8 = vpack.c.bf16 %v274_v58, %v274_v58 }
  0xca   :  { %358 = vrot.lane.b32.xlu1 %v285_v63, %s1710_s24 }
  0xcc   :  { %376 = vrot.lane.b32.xlu0 %v294_v7, %s1710_s24 }
  0xce   :  { %412 = vrot.lane.b32.xlu1 %v312_v11, %s1710_s24 }
  0xd0   :  { %386 = vrot.lane.b32.xlu0 %v299_v22, %s1710_s24 }
  0xd2   :  { %374 = vrot.lane.b32.xlu1 %v293_v20, %s1710_s24 }
  0xd4   :  { %390 = vrot.lane.b32.xlu0 %v301_v60, %s1710_s24 }
  0xd6   :  { %388 = vrot.lane.b32.xlu1 %v300_v16, %s1710_s24 }
  0xd8   :  { %400 = vrot.lane.b32.xlu0 %v306_v6, %s1710_s24 }
  0xda   :  { %392 = vrot.lane.b32.xlu1 %v302_v2, %s1710_s24 }
  0xdc   :  { %404 = vrot.lane.b32.xlu0 %v308_v42, %s1710_s24 }
  0xde   :  { %402 = vrot.lane.b32.xlu1 %v307_v49, %s1710_s24 }
  0xe0   :  { %414 = vrot.lane.b32.xlu0 %v313_v50, %s1710_s24 }
  0xe2   :  { %406 = vrot.lane.b32.xlu1 %v309_v53, %s1710_s24 }
  0xe4   :  { %418 = vrot.lane.b32.xlu0 %v315_v55, %s1710_s24 }
  0xe6   :  { %416 = vrot.lane.b32.xlu1 %v314_v48, %s1710_s24 }
  0xea   :  { %420 = vrot.lane.b32.xlu1 %v316_v8, %s1710_s24 }
 0x10e   :  { %v381_v61 = vpop.permute.xlu1 %380 }
 0x116   :  { %v395_v62 = vpop.permute.xlu0 %394 }
 0x11a   :  { %v409_v56 = vpop.permute.xlu1 %408  ;;  %v357_v17 = vpop.permute.xlu0 %356 }
 0x11e   :  { %v369_v29 = vpop.permute.xlu0 %368  ;;  %v365_v57 = vpop.permute.xlu1 %364 }
 0x122   :  { %v367_v63 = vpop.permute.xlu0 %366 }
 0x123   :  { %v429_v26 = vsel %vm422_vm8, %v367_v63, %v369_v29  ;;  %v626_v63 = vlaneseq }
 0x124   :  { %v379_v1 = vpop.permute.xlu1 %378 }
 0x126   :  { %v2065_v3 = vpop.permute.xlu0 %384 }
 0x128   :  { %v355_v5 = vpop.permute.xlu1 %354 }
 0x129   :  { %v424_v7 = vsel %vm422_vm8, %v355_v5, %v357_v17 }
 0x12a   :  { %500 = vmatprep.subr.bf16.mxu0 %v424_v7  ;;  %v397_v9 = vpop.permute.xlu0 %396 }
 0x12b   :  { %v441_v60 = vsel %vm422_vm8, %v395_v62, %v397_v9 }
 0x12c   :  { %v353_v10 = vpop.permute.xlu1 %352 }
 0x12d   :  { %v423_v4 = vsel %vm422_vm8, %v353_v10, %v355_v5  ;;  %v51_v5 = vld [vmem:[%s2589_s1] sm:$0x3f] }
 0x12e   :  { %501 = vmatpush1.bf16.msra.mxu0 %v423_v4  ;;  %v361_v11 = vpop.permute.xlu0 %360 }
 0x130   :  { %v371_v12 = vpop.permute.xlu1 %370 }
 0x131   :  { %v430_v13 = vsel %vm422_vm8, %v369_v29, %v371_v12 }
 0x132   :  { %502 = vmatprep.subr.bf16.mxu0 %v430_v13  ;;  %v411_v15 = vpop.permute.xlu0 %410 }
 0x133   :  { %503 = vmatpush1.bf16.msra.mxu0 %v429_v26  ;;  %v447_v39 = vsel %vm422_vm8, %v409_v56, %v411_v15 }
 0x134   :  { %v383_v31 = vpop.permute.xlu1 %382  ;;  %v483_v28 = vsel %vm481_vm9, %v447_v39, 0 }
 0x135   :  { %v436_v35 = vsel %vm422_vm8, %v383_v31, %v2065_v3  ;;  %v435_v37 = vsel %vm422_vm8, %v381_v61, %v383_v31 }
 0x136   :  { %504 = vmatprep.subr.bf16.mxu0 %v436_v35  ;;  %v363_v22 = vpop.permute.xlu0 %362 }
 0x137   :  { %505 = vmatpush1.bf16.msra.mxu0 %v435_v37  ;;  %v428_v16 = vsel %vm422_vm8, %v363_v22, %v365_v57  ;;  %v427_v36 = vsel %vm422_vm8, %v361_v11, %v363_v22 }
 0x138   :  { %v399_v54 = vpop.permute.xlu1 %398 }
 0x139   :  { %v442_v40 = vsel %vm422_vm8, %v397_v9, %v399_v54 }
 0x13a   :  { %506 = vmatprep.subr.bf16.mxu0 %v442_v40  ;;  %v373_v20 = vpop.permute.xlu0 %372 }
 0x13b   :  { %507 = vmatpush1.bf16.msra.mxu0 %v441_v60  ;;  %v431_v30 = vsel %vm422_vm8, %v371_v12, %v373_v20 }
 0x13c   :  { %v359_v34 = vpop.permute.xlu1 %358 }
 0x13d   :  { %v426_v43 = vsel %vm422_vm8, %v359_v34, %v361_v11  ;;  %v425_v44 = vsel %vm422_vm8, %v357_v17, %v359_v34 }
 0x13e   :  { %541 = vmatprep.subr.bf16.mxu1 %v426_v43  ;;  %v377_v45 = vpop.permute.xlu0 %376 }
 0x13f   :  { %542 = vmatpush1.bf16.msra.mxu1 %v425_v44  ;;  %v434_v41 = vsel %vm422_vm8, %v377_v45, %v379_v1  ;;  %v627_v1 = vshrl.u32 %v626_v63, 7 }
 0x140   :  { %v413_v33 = vpop.permute.xlu1 %412 }
 0x141   :  { %v448_v0 = vsel %vm422_vm8, %v411_v15, %v413_v33  ;;  %v632_v7 = vsub.s32 1, %v627_v1  ;;  %v640_v40 = vsub.s32 3, %v627_v1  ;;  %v644_v60 = vsub.s32 4, %v627_v1 }
 0x142   :  { %1376 = vmatprep.subr.msk.bf16.mxu0 %vm481_vm9, %v448_v0  ;;  %v387_v18 = vpop.permute.xlu0 %386  ;;  %v648_v43 = vsub.s32 5, %v627_v1 }
 0x143   :  { %509 = vmatpush1.bf16.msra.mxu0 %v483_v28  ;;  %v437_v25 = vsel %vm422_vm8, %v2065_v3, %v387_v18  ;;  %v628_v3 = vsub.s32 0, %v627_v1  ;;  %v2119_v10 = vrot.slane %v51_v5, %v632_v7  ;;  %v2131_v34 = vrot.slane %v51_v5, %v640_v40 }
 0x144   :  { %v375_v38 = vpop.permute.xlu1 %374  ;;  %582 = vmatprep.subr.bf16.mxu0 %v428_v16  ;;  %v2137_v28 = vrot.slane %v51_v5, %v648_v43 }
 0x145   :  { %v432_v19 = vsel %vm422_vm8, %v373_v20, %v375_v38  ;;  %v433_v46 = vsel %vm422_vm8, %v375_v38, %v377_v45  ;;  %v2117_v9 = vrot.slane %v51_v5, %v628_v3 }
 0x146   :  { %543 = vmatprep.subr.bf16.mxu1 %v432_v19  ;;  %v391_v6 = vpop.permute.xlu0 %390  ;;  %1377 = vmatmul.mubr.msk.bf16.vlgmr.msra.gmra.mrb[0].mxu0 %vm477_vm10, %v52_v32 }
 0x147   :  { %544 = vmatpush1.bf16.msra.mxu1 %v431_v30  ;;  %583 = vmatpush1.bf16.msra.mxu0 %v427_v36 }
 0x148   :  { %v389_v2 = vpop.permute.xlu1 %388  ;;  %584 = vmatprep.subr.bf16.mxu0 %v434_v41  ;;  %614 = vmatprep.mubr.bf16.mxu0 %v2597_v59 }
 0x149   :  { %v438_v42 = vsel %vm422_vm8, %v387_v18, %v389_v2  ;;  %v439_v49 = vsel %vm422_vm8, %v389_v2, %v391_v6 }
 0x14a   :  { %545 = vmatprep.subr.bf16.mxu1 %v438_v42  ;;  %v401_v23 = vpop.permute.xlu0 %400 }
 0x14b   :  { %546 = vmatpush1.bf16.msra.mxu1 %v437_v25  ;;  %585 = vmatpush1.bf16.msra.mxu0 %v433_v46  ;;  %v443_v50 = vsel %vm422_vm8, %v399_v54, %v401_v23  ;;  %v636_v54 = vsub.s32 2, %v627_v1 }
 0x14c   :  { %v393_v27 = vpop.permute.xlu1 %392 }
 0x14d   :  { %v440_v14 = vsel %vm422_vm8, %v391_v6, %v393_v27  ;;  %v2129_v20 = vrot.slane %v51_v5, %v636_v54 }
 0x14e   :  { %586 = vmatprep.subr.bf16.mxu0 %v440_v14  ;;  %v405_v21 = vpop.permute.xlu0 %404 }
 0x14f   :  { %587 = vmatpush1.bf16.msra.mxu0 %v439_v49 }
 0x150   :  { %v403_v24 = vpop.permute.xlu1 %402 }
 0x151   :  { %v444_v47 = vsel %vm422_vm8, %v401_v23, %v403_v24  ;;  %v445_v55 = vsel %vm422_vm8, %v403_v24, %v405_v21 }
 0x152   :  { %547 = vmatprep.subr.bf16.mxu1 %v444_v47  ;;  %v415_v51 = vpop.permute.xlu0 %414 }
 0x153   :  { %548 = vmatpush1.bf16.msra.mxu1 %v443_v50  ;;  %v449_v48 = vsel %vm422_vm8, %v413_v33, %v415_v51  ;;  %v2134_v33 = vrot.slane %v51_v5, %v644_v60 }
 0x154   :  { %v407_v52 = vpop.permute.xlu1 %406  ;;  %v489_v62 = vsel %vm481_vm9, %v449_v48, 0 }
 0x155   :  { %v446_v53 = vsel %vm422_vm8, %v405_v21, %v407_v52 }
 0x156   :  { %588 = vmatprep.subr.bf16.mxu0 %v446_v53  ;;  %v419_v8 = vpop.permute.xlu0 %418 }
 0x157   :  { %589 = vmatpush1.bf16.msra.mxu0 %v445_v55 }
 0x158   :  { %v417_v58 = vpop.permute.xlu1 %416 }
 0x159   :  { %v450_v61 = vsel %vm422_vm8, %v415_v51, %v417_v58  ;;  %v451_v56 = vsel %vm422_vm8, %v417_v58, %v419_v8 }
 0x15a   :  { %1378 = vmatprep.subr.msk.bf16.mxu1 %vm481_vm9, %v450_v61  ;;  %v495_v57 = vsel %vm481_vm9, %v451_v56, 0  ;;  %v624_v56 = vld [vmem:[%s2593_s5] sm:$0xff] }
 0x15b   :  { %550 = vmatpush1.bf16.msra.mxu1 %v489_v62 }
 0x15c   :  { %v421_v17 = vpop.permute.xlu1 %420 }
 0x15d   :  { %v452_v29 = vsel %vm422_vm8, %v419_v8, %v421_v17  ;;  %v623_v8 = vld [vmem:[%s2592_s4] sm:$0xff] }
 0x15e   :  { %1379 = vmatmul.mubr.msk.bf16.vlgmr.msra.gmra.mrb[0].mxu1 %vm477_vm10, %v52_v32  ;;  %1380 = vmatprep.subr.msk.bf16.mxu0 %vm481_vm9, %v452_v29 }
 0x15f   :  { %591 = vmatpush1.bf16.msra.mxu0 %v495_v57  ;;  %1193 = vmatprep.mubr.bf16.mxu1 %v2597_v59  ;;  %v1712_v57 = vmov 0.0  }
 0x162   :  { %1381 = vmatmul.mubr.msk.bf16.vlgmr.msra.gmra.mrb[4].mxu0 %vm477_vm10, %v52_v32 }
 0x163   :  { %1234 = vmatprep.mubr.bf16.mxu0 %v2597_v59 }
 0x219   :  { %v2121_v4 = vpop.f32.mrb[0].mxu0 }
 0x21a   :  { %v656_v11 = vmul.f32 %v2117_v9, %v2121_v4  ;;  %v2125_v12 = vpop.f32.mrb[1].mxu0 }
 0x21b   :  { %v657_v13 = vmul.f32 %v2119_v10, %v2125_v12  ;;  %v538_v15 = vpop.f32.mrb[2].mxu0 }
 0x21c   :  { %v670_v26 = vmul.f32 %v656_v11, %v656_v11  ;;  %v539_v31 = vpop.f32.mrb[3].mxu0 }
 0x21d   :  { %v662_v35 = vadd.f32 %v657_v13, %v656_v11  ;;  %v671_v37 = vmul.f32 %v657_v13, %v657_v13 }
 0x21f   :  { %v676_v22 = vadd.f32 %v671_v37, %v670_v26 }
 0x231   :  { %v575_v44 = vpop.f32.mrb[0].mxu1 }
 0x232   :  { %v658_v45 = vmul.f32 %v2129_v20, %v575_v44  ;;  %v577_v39 = vpop.f32.mrb[1].mxu1 }
 0x233   :  { %v659_v0 = vmul.f32 %v2131_v34, %v577_v39  ;;  %v579_v18 = vpop.f32.mrb[2].mxu1 }
 0x234   :  { %v663_v16 = vadd.f32 %v662_v35, %v658_v45  ;;  %v672_v32 = vmul.f32 %v658_v45, %v658_v45  ;;  %v580_v38 = vpop.f32.mrb[3].mxu1 }
 0x235   :  { %v673_v19 = vmul.f32 %v659_v0, %v659_v0  ;;  %v616_v36 = vpop.f32.mrb[4].mxu0 }
 0x236   :  { %v677_v6 = vadd.f32 %v676_v22, %v672_v32  ;;  %v664_v30 = vadd.f32 %v663_v16, %v659_v0  ;;  %v660_v41 = vmul.f32 %v2134_v33, %v616_v36  ;;  %v2140_v2 = vpop.f32.mrb[5].mxu0 }
 0x237   :  { %v661_v42 = vmul.f32 %v2137_v28, %v2140_v2  ;;  %v620_v46 = vpop.f32.mrb[6].mxu0 }
 0x238   :  { %v674_v23 = vmul.f32 %v660_v41, %v660_v41  ;;  %v621_v25 = vpop.f32.mrb[7].mxu0  ;;  %v665_v27 = vadd.f32 %v664_v30, %v660_v41  ;;  %v678_v14 = vadd.f32 %v677_v6, %v673_v19 }
 0x239   :  { %v675_v49 = vmul.f32 %v661_v42, %v661_v42 }
 0x23a   :  { %v666_v21 = vadd.f32 %v665_v27, %v661_v42  ;;  %v679_v24 = vadd.f32 %v678_v14, %v674_v23 }
 0x23c   :  { %667 = vadd.xlane.f32.xlu0 %v666_v21  ;;  %v680_v47 = vadd.f32 %v679_v24, %v675_v49 }
 0x23e   :  { %681 = vadd.xlane.f32.xlu1 %v680_v47 }
 0x2c9   :  { %v668_v50 = vpop.xlane.xlu0 %667 }
 0x2ca   :  { %v669_v51 = vmul.f32 0.001953125, %v668_v50 }
 0x2cb   :  { %v682_v52 = vpop.xlane.xlu1 %681 }
 0x2cc   :  { %v684_v53 = vmul.f32 %v669_v51, %v669_v51  ;;  %v683_v55 = vmul.f32 0.001953125, %v682_v52 }
 0x2ce   :  { %v685_v48 = vsub.f32 %v683_v55, %v684_v53 }
 0x2d0   :  { %v686_v58 = vadd.f32 1e-05, %v685_v48 }
 0x2d2   :  { %1643 = vrsqrt.f32 %v686_v58 }
 0x2dc   :  { %v1644_v61 = vpop.eup %1643 }
 0x2dd   :  { %v688_v62 = vmul.f32 %v1644_v61, %v623_v8 }
 0x2df   :  { %693 = vperm.xlu0 %1521, %v688_v62   ;;  %v689_v17 = vmul.f32 %v688_v62, %v669_v51 }
 0x2e1   :  { %v690_v29 = vsub.f32 %v624_v56, %v689_v17 }
 0x2e3   :  { %704 = vperm.xlu1 %1522, %v690_v29   ;;  %850 = vrot.lane.b32.xlu0 %v1712_v57, %s1706_s20 }
 0x2e7   :  { %877 = vrot.lane.b32.xlu1 %v1712_v57, %s1707_s21  ;;  %904 = vrot.lane.b32.xlu0 %v1712_v57, %s1708_s22 }
 0x35e   :  { %v694_v63 = vpop.permute.xlu0 %693 }
 0x35f   :  { %v696_v1 = vmul.f32 %v694_v63, %v2121_v4  ;;  %v697_v3 = vmul.f32 %v694_v63, %v2125_v12  ;;  %v698_v5 = vmul.f32 %v694_v63, %v575_v44  ;;  %v699_v12 = vmul.f32 %v694_v63, %v577_v39 }
 0x360   :  { %v700_v40 = vmul.f32 %v694_v63, %v616_v36  ;;  %v701_v32 = vmul.f32 %v694_v63, %v2140_v2 }
 0x362   :  { %v705_v7 = vpop.permute.xlu1 %704  ;;  %v2221_v2 = vpop.permute.xlu0 %850 }
 0x363   :  { %v707_v11 = vadd.f32 %v705_v7, %v696_v1  ;;  %v708_v13 = vadd.f32 %v705_v7, %v697_v3  ;;  %v709_v15 = vadd.f32 %v705_v7, %v698_v5  ;;  %v710_v60 = vadd.f32 %v705_v7, %v699_v12 }
 0x364   :  { %v711_v43 = vadd.f32 %v705_v7, %v700_v40  ;;  %v712_v38 = vadd.f32 %v705_v7, %v701_v32 }
 0x365   :  { %v713_v26 = vmax.f32 %v707_v11, 0.0  ;;  %v714_v31 = vmax.f32 %v708_v13, 0.0  ;;  %v715_v35 = vmax.f32 %v709_v15, 0.0  ;;  %v716_v45 = vmax.f32 %v710_v60, 0.0 }
 0x366   :  { %v717_v0 = vmax.f32 %v711_v43, 0.0  ;;  %v718_v19 = vmax.f32 %v712_v38, 0.0  ;;  %v2223_v42 = vpop.permute.xlu0 %904  ;;  %v2225_v46 = vpop.permute.xlu1 %877 }
 0x367   :  { %v2159_v37 = vmul.f32 %v713_v26, %v2117_v9  ;;  %v2162_v22 = vmul.f32 %v714_v31, %v2119_v10  ;;  %v2165_v54 = vmul.f32 %v715_v35, %v2129_v20  ;;  %v2178_v39 = vmul.f32 %v716_v45, %v2131_v34 }
 0x368   :  { %v2181_v18 = vmul.f32 %v717_v0, %v2134_v33  ;;  %v2198_v6 = vmul.f32 %v718_v19, %v2137_v28 }
 0x369   :  { %v1553_v4 = vpack.i.bf16 %v2162_v22, %v2159_v37  ;;  %v1528_v44 = vpack.i.bf16 %v1712_v57, %v2165_v54  ;;  %v1558_v36 = vpack.i.bf16 %v2178_v39, %v2165_v54 }
 0x36a   :  { %v1593_v16 = vpack.i.bf16 %v2181_v18, %v2178_v39  ;;  %v1613_v30 = vpack.i.bf16 %v2198_v6, %v2181_v18  ;;  %v1638_v41 = vpack.i.bf16 %v1712_v57, %v2198_v6 }
 0x36b   :  { %1554 = vrot.lane.b32.xlu0 %v1553_v4, %s1705_s19  ;;  %1524 = vrot.lane.b32.xlu1 %v1553_v4, %s1703_s18 }
 0x36f   :  { %1564 = vrot.lane.b32.xlu0 %v1553_v4, %s1706_s20  ;;  %1529 = vrot.lane.b32.xlu1 %v1528_v44, %s1703_s18 }
 0x373   :  { %1574 = vrot.lane.b32.xlu0 %v1553_v4, %s1707_s21  ;;  %1534 = vrot.lane.b32.xlu1 %v1553_v4, %s1702_s17 }
 0x377   :  { %1584 = vrot.lane.b32.xlu0 %v1553_v4, %s1708_s22  ;;  %1539 = vrot.lane.b32.xlu1 %v1528_v44, %s1702_s17 }
 0x37b   :  { %1594 = vrot.lane.b32.xlu0 %v1593_v16, %s1703_s18  ;;  %1544 = vrot.lane.b32.xlu1 %v1553_v4, %s1704_s0 }
 0x37f   :  { %923 = vrot.lane.b32.xlu0 %v2165_v54, %s1709_s23  ;;  %1549 = vrot.lane.b32.xlu1 %v1528_v44, %s1704_s0 }
 0x383   :  { %1604 = vrot.lane.b32.xlu0 %v1593_v16, %s1702_s17  ;;  %1559 = vrot.lane.b32.xlu1 %v1558_v36, %s1705_s19 }
 0x387   :  { %772 = vrot.lane.b32.xlu0 %v2198_v6, %s1702_s17  ;;  %1569 = vrot.lane.b32.xlu1 %v1558_v36, %s1706_s20 }
 0x38b   :  { %1614 = vrot.lane.b32.xlu0 %v1613_v30, %s1705_s19  ;;  %1579 = vrot.lane.b32.xlu1 %v1558_v36, %s1707_s21 }
 0x38f   :  { %1629 = vrot.lane.b32.xlu0 %v1613_v30, %s1708_s22  ;;  %1589 = vrot.lane.b32.xlu1 %v1558_v36, %s1708_s22 }
 0x393   :  { %1639 = vrot.lane.b32.xlu0 %v1638_v41, %s1709_s23  ;;  %1599 = vrot.lane.b32.xlu1 %v1553_v4, %s1709_s23 }
 0x397   :  { %745 = vrot.lane.b32.xlu1 %v2198_v6, %s1703_s18 }
 0x39b   :  { %1609 = vrot.lane.b32.xlu1 %v1593_v16, %s1704_s0 }
 0x39f   :  { %799 = vrot.lane.b32.xlu1 %v2198_v6, %s1704_s0 }
 0x3a3   :  { %1619 = vrot.lane.b32.xlu1 %v1613_v30, %s1706_s20 }
 0x3a7   :  { %1624 = vrot.lane.b32.xlu1 %v1613_v30, %s1707_s21 }
 0x3ab   :  { %1634 = vrot.lane.b32.xlu1 %v1593_v16, %s1709_s23 }
 0x3dd   :  { %v2227_v23 = vpop.permute.xlu0 %1554  ;;  %v2229_v25 = vpop.permute.xlu1 %1524 }
 0x3de   :  { %v1556_v49 = vunpack.i.l.bf16 %v2227_v23  ;;  %v1527_v58 = vunpack.i.h.bf16 %v2229_v25  ;;  %v1557_v60 = vunpack.i.h.bf16 %v2227_v23 }
 0x3e1   :  { %v2231_v27 = vpop.permute.xlu0 %1564  ;;  %v2233_v14 = vpop.permute.xlu1 %1529 }
 0x3e2   :  { %v1566_v21 = vunpack.i.l.bf16 %v2231_v27  ;;  %v1531_v51 = vunpack.i.l.bf16 %v2233_v14  ;;  %v1567_v43 = vunpack.i.h.bf16 %v2231_v27 }
 0x3e4   :  { %v960_v24 = vpack.c.bf16 %v1566_v21, %v1556_v49  ;;  %v749_v61 = vsel %vm74_vm0, %v1527_v58, %v1531_v51 }
 0x3e5   :  { %v2241_v47 = vpop.permute.xlu0 %1574  ;;  %v2243_v50 = vpop.permute.xlu1 %1534  ;;  %v948_v1 = vpack.c.bf16 %v749_v61, %v2162_v22 }
 0x3e6   :  { %1044 = vrot.lane.b32.xlu1 %v960_v24, %s1710_s24  ;;  %v1576_v55 = vunpack.i.l.bf16 %v2241_v47  ;;  %v1537_v29 = vunpack.i.h.bf16 %v2243_v50  ;;  %v1536_v63 = vunpack.i.l.bf16 %v2243_v50  ;;  %v1577_v0 = vunpack.i.h.bf16 %v2241_v47 }
 0x3e8   :  { %v775_v11 = vsel %vm102_vm2, %v1536_v63, %v1537_v29 }
 0x3e9   :  { %v2247_v52 = vpop.permute.xlu0 %1584  ;;  %v2249_v53 = vpop.permute.xlu1 %1539 }
 0x3ea   :  { %v1586_v48 = vunpack.i.l.bf16 %v2247_v52  ;;  %v1542_v13 = vunpack.i.h.bf16 %v2249_v53  ;;  %v1587_v44 = vunpack.i.h.bf16 %v2247_v52 }
 0x3ec   :  { %v967_v8 = vpack.c.bf16 %v1586_v48, %v1576_v55  ;;  %v774_v35 = vsel %vm102_vm2, %v1542_v13, %v1536_v63  ;;  %v906_v30 = vsel %vm240_vm5, %v1586_v48, %v1587_v44 }
 0x3ed   :  { %v2259_v62 = vpop.permute.xlu1 %1544  ;;  %v2283_v22 = vpop.permute.xlu0 %1594 }
 0x3ee   :  { %v1547_v56 = vunpack.i.h.bf16 %v2259_v62  ;;  %v1546_v17 = vunpack.i.l.bf16 %v2259_v62  ;;  %1058 = vrot.lane.b32.xlu0 %v967_v8, %s1710_s24  ;;  %v1597_v41 = vunpack.i.h.bf16 %v2283_v22  ;;  %v1596_v24 = vunpack.i.l.bf16 %v2283_v22 }
 0x3ef   :  { %v879_v8 = vsel %vm212_vm6, %v1576_v55, %v1577_v0 }
 0x3f0   :  { %v802_v3 = vsel %vm130_vm1, %v1546_v17, %v1547_v56  ;;  %v968_v61 = vpack.c.bf16 %v906_v30, %v879_v8  ;;  %v751_v63 = vsel %vm74_vm0, %v1596_v24, %v1597_v41  ;;  %v1541_v30 = vunpack.i.l.bf16 %v2249_v53 }
 0x3f1   :  { %v2270_v5 = vpop.permute.xlu1 %1549  ;;  %v954_v15 = vpack.c.bf16 %v802_v3, %v775_v11  ;;  %v2304_v38 = vpop.permute.xlu0 %923  ;;  %v950_v48 = vpack.c.bf16 %v751_v63, %v2178_v39  ;;  %v750_v52 = vsel %vm74_vm0, %v1531_v51, %v1596_v24 }
 0x3f2   :  { %v1552_v7 = vunpack.i.h.bf16 %v2270_v5  ;;  %1020 = vrot.lane.b32.xlu0 %v948_v1, %s1710_s24  ;;  %v1551_v8 = vunpack.i.l.bf16 %v2270_v5 }
 0x3f4   :  { %v801_v26 = vsel %vm130_vm1, %v1552_v7, %v1546_v17 }
 0x3f5   :  { %v2279_v31 = vpop.permute.xlu1 %1559  ;;  %v953_v4 = vpack.c.bf16 %v801_v26, %v774_v35  ;;  %v2322_v1 = vpop.permute.xlu0 %1604 }
 0x3f6   :  { %1032 = vrot.lane.b32.xlu0 %v954_v15, %s1710_s24  ;;  %v1561_v12 = vunpack.i.l.bf16 %v2279_v31  ;;  %v1606_v39 = vunpack.i.l.bf16 %v2322_v1 }
 0x3f8   :  { %v827_v16 = vsel %vm156_vm4, %v1557_v60, %v1561_v12 }
 0x3f9   :  { %v2286_v40 = vpop.permute.xlu1 %1569  ;;  %v773_v55 = vpop.permute.xlu0 %772 }
 0x3fa   :  { %v1571_v45 = vunpack.i.l.bf16 %v2286_v40  ;;  %1030 = vrot.lane.b32.xlu0 %v953_v4, %s1710_s24 }
 0x3fc   :  { %v853_v32 = vsel %vm184_vm3, %v1567_v43, %v1571_v45 }
 0x3fd   :  { %v962_v19 = vpack.c.bf16 %v853_v32, %v827_v16  ;;  %v2306_v36 = vpop.permute.xlu1 %1579  ;;  %v1526_v16 = vunpack.i.l.bf16 %v2229_v25  ;;  %v2346_v63 = vpop.permute.xlu0 %1614 }
 0x3ff   :  { %1048 = vrot.lane.b32.xlu0 %v962_v19, %s1710_s24 }
 0x401   :  { %v2317_v17 = vpop.permute.xlu1 %1589 }
 0x403   :  { %1060 = vrot.lane.b32.xlu0 %v968_v61, %s1710_s24 }
 0x405   :  { %v2326_v3 = vpop.permute.xlu1 %1599 }
 0x406   :  { %v1602_v7 = vunpack.i.h.bf16 %v2326_v3  ;;  %v1601_v11 = vunpack.i.l.bf16 %v2326_v3 }
 0x407   :  { %1024 = vrot.lane.b32.xlu0 %v950_v48, %s1710_s24  ;;  %v777_v48 = vsel %vm102_vm2, %v1541_v30, %v1606_v39 }
 0x408   :  { %v933_v13 = vsel %vm268_vm7, %v1601_v11, %v1602_v7  ;;  %v974_v15 = vpack.c.bf16 %v1601_v11, %v1601_v11  ;;  %v748_v11 = vsel %vm74_vm0, %v1526_v16, %v1527_v58  ;;  %v2372_v58 = vpop.permute.xlu0 %1629  ;;  %v934_v22 = vsel %vm268_vm7, %v1602_v7, %v2304_v38 }
 0x409   :  { %v746_v26 = vpop.permute.xlu1 %745  ;;  %v975_v35 = vpack.c.bf16 %v933_v13, %v933_v13  ;;  %v976_v51 = vpack.c.bf16 %v934_v22, %v934_v22  ;;  %v2599_v7 = vunpack.i.h.bf16 %v2286_v40 }
 0x40a   :  { %v752_v4 = vsel %vm74_vm0, %v1597_v41, %v746_v26  ;;  %1072 = vrot.lane.b32.xlu1 %v974_v15, %s1710_s24  ;;  %v952_v32 = vpack.c.bf16 %v746_v26, %v2198_v6  ;;  %v1532_v15 = vunpack.i.h.bf16 %v2233_v14  ;;  %v1607_v26 = vunpack.i.h.bf16 %v2322_v1 }
 0x40b   :  { %1074 = vrot.lane.b32.xlu0 %v975_v35, %s1710_s24  ;;  %v951_v61 = vpack.c.bf16 %v752_v4, %v2181_v18  ;;  %v2598_v35 = vunpack.i.h.bf16 %v2286_v40 }
 0x40c   :  { %v779_v25 = vsel %vm102_vm2, %v1607_v26, %v773_v55  ;;  %v747_v59 = vsel %vm74_vm0, %v1532_v15, %v1526_v16  ;;  %v1617_v16 = vunpack.i.h.bf16 %v2346_v63 }
 0x40d   :  { %v2340_v19 = vpop.permute.xlu1 %1609  ;;  %v946_v15 = vpack.c.bf16 %v747_v59, %v1712_v57  ;;  %v776_v59 = vsel %vm102_vm2, %v1537_v29, %v1541_v30  ;;  %v1581_v29 = vunpack.i.l.bf16 %v2306_v36 }
 0x40e   :  { %v1611_v41 = vunpack.i.l.bf16 %v2340_v19  ;;  %1028 = vrot.lane.b32.xlu1 %v952_v32, %s1710_s24  ;;  %v1612_v53 = vunpack.i.h.bf16 %v2340_v19  ;;  %v1562_v32 = vunpack.i.h.bf16 %v2279_v31 }
 0x40f   :  { %1026 = vrot.lane.b32.xlu0 %v951_v61, %s1710_s24  ;;  %v880_v23 = vsel %vm212_vm6, %v1577_v0, %v1581_v29  ;;  %v949_v0 = vpack.c.bf16 %v750_v52, %v2165_v54 }
 0x410   :  { %v804_v6 = vsel %vm130_vm1, %v1551_v8, %v1611_v41  ;;  %v805_v54 = vsel %vm130_vm1, %v1611_v41, %v1612_v53 }
 0x411   :  { %v956_v5 = vpack.c.bf16 %v804_v6, %v777_v48  ;;  %v800_v18 = vpop.permute.xlu1 %799  ;;  %v947_v48 = vpack.c.bf16 %v748_v11, %v2159_v37  ;;  %v828_v37 = vsel %vm156_vm4, %v1561_v12, %v1562_v32 }
 0x412   :  { %v959_v13 = vpack.c.bf16 %v800_v18, %v773_v55  ;;  %v806_v4 = vsel %vm130_vm1, %v1612_v53, %v800_v18  ;;  %v1632_v55 = vunpack.i.h.bf16 %v2372_v58 }
 0x413   :  { %1036 = vrot.lane.b32.xlu0 %v956_v5, %s1710_s24  ;;  %v958_v6 = vpack.c.bf16 %v806_v4, %v779_v25  ;;  %v854_v5 = vsel %vm184_vm3, %v1571_v45, %v2598_v35  ;;  %v1616_v45 = vunpack.i.l.bf16 %v2346_v63  ;;  %v1591_v35 = vunpack.i.l.bf16 %v2317_v17 }
 0x414   :  { %1042 = vrot.lane.b32.xlu1 %v959_v13, %s1710_s24  ;;  %v963_v4 = vpack.c.bf16 %v854_v5, %v828_v37  ;;  %v2414_v57 = vsel %vm240_vm5, %v1632_v55, %v2223_v42 }
 0x415   :  { %v2374_v61 = vpop.permute.xlu1 %1619  ;;  %v830_v50 = vsel %vm156_vm4, %v1616_v45, %v1617_v16  ;;  %v829_v19 = vsel %vm156_vm4, %v1562_v32, %v1616_v45 }
 0x416   :  { %v1622_v18 = vunpack.i.h.bf16 %v2374_v61  ;;  %v1621_v13 = vunpack.i.l.bf16 %v2374_v61 }
 0x417   :  { %1040 = vrot.lane.b32.xlu0 %v958_v6, %s1710_s24  ;;  %v1592_v6 = vunpack.i.h.bf16 %v2317_v17 }
 0x418   :  { %1018 = vrot.lane.b32.xlu1 %v947_v48, %s1710_s24  ;;  %v803_v48 = vsel %vm130_vm1, %v1547_v56, %v1551_v8  ;;  %v856_v12 = vsel %vm184_vm3, %v1621_v13, %v1622_v18  ;;  %v1582_v56 = vunpack.i.h.bf16 %v2306_v36  ;;  %v852_v8 = vsel %vm184_vm3, %v1566_v21, %v1567_v43 }
 0x419   :  { %v2395_v11 = vpop.permute.xlu1 %1624  ;;  %v955_v30 = vpack.c.bf16 %v803_v48, %v776_v59  ;;  %v908_v5 = vsel %vm240_vm5, %v1591_v35, %v1592_v6  ;;  %v826_v36 = vsel %vm156_vm4, %v1556_v49, %v1557_v60  ;;  %v1631_v21 = vunpack.i.l.bf16 %v2372_v58  ;;  %v1640_v58 = vpop.permute.xlu0 %1639 }
 0x41a   :  { %v1627_v25 = vunpack.i.h.bf16 %v2395_v11  ;;  %v1626_v37 = vunpack.i.l.bf16 %v2395_v11  ;;  %v881_v27 = vsel %vm212_vm6, %v1581_v29, %v1582_v56  ;;  %v961_v43 = vpack.c.bf16 %v852_v8, %v826_v36 }
 0x41b   :  { %1050 = vrot.lane.b32.xlu0 %v963_v4, %s1710_s24  ;;  %v970_v4 = vpack.c.bf16 %v908_v5, %v881_v27  ;;  %v907_v11 = vsel %vm240_vm5, %v1587_v44, %v1591_v35  ;;  %v910_v49 = vsel %vm240_vm5, %v1631_v21, %v1632_v55  ;;  %v1641_v47 = vunpack.i.l.bf16 %v1640_v58 }
 0x41c   :  { %v2418_v62 = vsel %vm212_vm6, %v1627_v25, %v2225_v46  ;;  %1016 = vrot.lane.b32.xlu1 %v946_v15, %s1710_s24  ;;  %v965_v46 = vpack.c.bf16 %v856_v12, %v830_v50  ;;  %v883_v48 = vsel %vm212_vm6, %v1626_v37, %v1627_v25  ;;  %v969_v60 = vpack.c.bf16 %v907_v11, %v880_v23 }
 0x41d   :  { %v973_v42 = vpack.c.bf16 %v2414_v57, %v2418_v62  ;;  %v1635_v15 = vpop.permute.xlu1 %1634  ;;  %v972_v59 = vpack.c.bf16 %v910_v49, %v883_v48  ;;  %v855_v25 = vsel %vm184_vm3, %v2599_v7, %v1621_v13  ;;  %v857_v1 = vsel %vm184_vm3, %v1622_v18, %v2221_v2 }
 0x41e   :  { %v1636_v12 = vunpack.i.l.bf16 %v1635_v15  ;;  %v1637_v44 = vunpack.i.h.bf16 %v1635_v15  ;;  %v964_v41 = vpack.c.bf16 %v855_v25, %v829_v19  ;;  %v966_v40 = vpack.c.bf16 %v857_v1, %v1617_v16 }
 0x41f   :  { %1054 = vrot.lane.b32.xlu0 %v965_v46, %s1710_s24  ;;  %v909_v31 = vsel %vm240_vm5, %v1592_v6, %v1631_v21  ;;  %v2600_v19 = vmov 0  }
 0x420   :  { %1034 = vrot.lane.b32.xlu1 %v955_v30, %s1710_s24  ;;  %v935_v35 = vsel %vm268_vm7, %v2304_v38, %v1636_v12  ;;  %v937_v14 = vsel %vm268_vm7, %v1637_v44, %v1641_v47  ;;  %v778_v38 = vsel %vm102_vm2, %v1606_v39, %v1607_v26  ;;  %v882_v39 = vsel %vm212_vm6, %v1582_v56, %v1626_v37 }
 0x421   :  { %v977_v55 = vpack.c.bf16 %v935_v35, %v935_v35  ;;  %v979_v24 = vpack.c.bf16 %v937_v14, %v937_v14  ;;  %v957_v3 = vpack.c.bf16 %v805_v54, %v778_v38  ;;  %v971_v53 = vpack.c.bf16 %v909_v31, %v882_v39  ;;  %v725_v14 = vld [vmem:[%s2591_s3] sm:$0xf] }
 0x422   :  { %v1642_v26 = vunpack.i.h.bf16 %v1640_v58  ;;  %v936_v32 = vsel %vm268_vm7, %v1636_v12, %v1637_v44 }
 0x423   :  { %1064 = vrot.lane.b32.xlu0 %v970_v4, %s1710_s24  ;;  %v978_v2 = vpack.c.bf16 %v936_v32, %v936_v32 }
 0x424   :  { %1046 = vrot.lane.b32.xlu1 %v961_v43, %s1710_s24  ;;  %v938_v63 = vsel %vm268_vm7, %v1641_v47, %v1642_v26 }
 0x425   :  { %v980_v61 = vpack.c.bf16 %v938_v63, %v938_v63 }
 0x427   :  { %1068 = vrot.lane.b32.xlu0 %v972_v59, %s1710_s24 }
 0x428   :  { %1062 = vrot.lane.b32.xlu1 %v969_v60, %s1710_s24 }
 0x42b   :  { %1078 = vrot.lane.b32.xlu0 %v977_v55, %s1710_s24 }
 0x42c   :  { %1022 = vrot.lane.b32.xlu1 %v949_v0, %s1710_s24 }
 0x42f   :  { %1082 = vrot.lane.b32.xlu0 %v979_v24, %s1710_s24 }
 0x430   :  { %1076 = vrot.lane.b32.xlu1 %v976_v51, %s1710_s24 }
 0x434   :  { %1038 = vrot.lane.b32.xlu1 %v957_v3, %s1710_s24 }
 0x438   :  { %1052 = vrot.lane.b32.xlu1 %v964_v41, %s1710_s24 }
 0x43c   :  { %1056 = vrot.lane.b32.xlu1 %v966_v40, %s1710_s24 }
 0x440   :  { %1066 = vrot.lane.b32.xlu1 %v971_v53, %s1710_s24 }
 0x444   :  { %1070 = vrot.lane.b32.xlu1 %v973_v42, %s1710_s24 }
 0x448   :  { %1080 = vrot.lane.b32.xlu1 %v978_v2, %s1710_s24 }
 0x44c   :  { %1084 = vrot.lane.b32.xlu1 %v980_v61, %s1710_s24 }
 0x458   :  { %v1045_v6 = vpop.permute.xlu1 %1044 }
 0x460   :  { %v1059_v18 = vpop.permute.xlu0 %1058 }
 0x464   :  { %v1021_v17 = vpop.permute.xlu0 %1020 }
 0x468   :  { %v1033_v13 = vpop.permute.xlu0 %1032 }
 0x46c   :  { %v1031_v16 = vpop.permute.xlu0 %1030 }
 0x46d   :  { %v1092_v21 = vsel %vm422_vm8, %v1031_v16, %v1033_v13 }
 0x471   :  { %v2517_v45 = vpop.permute.xlu0 %1048 }
 0x475   :  { %v1061_v57 = vpop.permute.xlu0 %1060 }
 0x476   :  { %v1104_v49 = vsel %vm422_vm8, %v1059_v18, %v1061_v57 }
 0x479   :  { %v1025_v50 = vpop.permute.xlu0 %1024 }
 0x47c   :  { %v1073_v62 = vpop.permute.xlu1 %1072 }
 0x47d   :  { %v1075_v29 = vpop.permute.xlu0 %1074 }
 0x47e   :  { %v1110_v44 = vsel %vm422_vm8, %v1073_v62, %v1075_v29 }
 0x47f   :  { %v1144_v0 = vsel %vm481_vm9, %v1110_v44, 0 }
 0x480   :  { %v1029_v56 = vpop.permute.xlu1 %1028 }
 0x481   :  { %v1027_v8 = vpop.permute.xlu0 %1026 }
 0x482   :  { %v1091_v22 = vsel %vm422_vm8, %v1027_v8, %v1029_v56  ;;  %v1090_v54 = vsel %vm422_vm8, %v1025_v50, %v1027_v8 }
 0x485   :  { %v1037_v15 = vpop.permute.xlu0 %1036 }
 0x486   :  { %v1043_v42 = vpop.permute.xlu1 %1042 }
 0x489   :  { %v1041_v48 = vpop.permute.xlu0 %1040 }
 0x48a   :  { %v1019_v30 = vpop.permute.xlu1 %1018  ;;  %v1097_v3 = vsel %vm422_vm8, %v1041_v48, %v1043_v42 }
 0x48b   :  { %v1087_v46 = vsel %vm422_vm8, %v1019_v30, %v1021_v17 }
 0x48c   :  { %1161 = vmatprep.subr.bf16.mxu1 %v1087_v46 }
 0x48d   :  { %v1051_v60 = vpop.permute.xlu0 %1050 }
 0x48e   :  { %v1017_v5 = vpop.permute.xlu1 %1016  ;;  %v1100_v1 = vsel %vm422_vm8, %v2517_v45, %v1051_v60 }
 0x48f   :  { %v1086_v37 = vsel %vm422_vm8, %v1017_v5, %v1019_v30 }
 0x490   :  { %1162 = vmatpush1.bf16.msra.mxu1 %v1086_v37 }
 0x491   :  { %v1055_v55 = vpop.permute.xlu0 %1054 }
 0x492   :  { %v1035_v36 = vpop.permute.xlu1 %1034 }
 0x493   :  { %v1093_v27 = vsel %vm422_vm8, %v1033_v13, %v1035_v36  ;;  %v1094_v38 = vsel %vm422_vm8, %v1035_v36, %v1037_v15 }
 0x494   :  { %1163 = vmatprep.subr.bf16.mxu1 %v1093_v27 }
 0x495   :  { %1164 = vmatpush1.bf16.msra.mxu1 %v1092_v21  ;;  %v1065_v7 = vpop.permute.xlu0 %1064 }
 0x496   :  { %v1047_v43 = vpop.permute.xlu1 %1046 }
 0x497   :  { %v1098_v4 = vsel %vm422_vm8, %v1045_v6, %v1047_v43  ;;  %v1099_v11 = vsel %vm422_vm8, %v1047_v43, %v2517_v45 }
 0x498   :  { %1165 = vmatprep.subr.bf16.mxu1 %v1099_v11 }
 0x499   :  { %1166 = vmatpush1.bf16.msra.mxu1 %v1098_v4  ;;  %v1069_v53 = vpop.permute.xlu0 %1068 }
 0x49a   :  { %v1063_v12 = vpop.permute.xlu1 %1062 }
 0x49b   :  { %v1105_v23 = vsel %vm422_vm8, %v1061_v57, %v1063_v12  ;;  %v1106_v63 = vsel %vm422_vm8, %v1063_v12, %v1065_v7 }
 0x49c   :  { %1167 = vmatprep.subr.bf16.mxu1 %v1105_v23 }
 0x49d   :  { %1168 = vmatpush1.bf16.msra.mxu1 %v1104_v49  ;;  %v1079_v61 = vpop.permute.xlu0 %1078 }
 0x49e   :  { %v1023_v58 = vpop.permute.xlu1 %1022 }
 0x49f   :  { %v1088_v59 = vsel %vm422_vm8, %v1021_v17, %v1023_v58  ;;  %v1089_v52 = vsel %vm422_vm8, %v1023_v58, %v1025_v50 }
 0x4a0   :  { %1202 = vmatprep.subr.bf16.mxu0 %v1089_v52 }
 0x4a1   :  { %1203 = vmatpush1.bf16.msra.mxu0 %v1088_v59  ;;  %v1083_v57 = vpop.permute.xlu0 %1082 }
 0x4a2   :  { %v1077_v35 = vpop.permute.xlu1 %1076 }
 0x4a3   :  { %v1111_v47 = vsel %vm422_vm8, %v1075_v29, %v1077_v35  ;;  %v1112_v16 = vsel %vm422_vm8, %v1077_v35, %v1079_v61 }
 0x4a4   :  { %1382 = vmatprep.subr.msk.bf16.mxu1 %vm481_vm9, %v1111_v47  ;;  %v1150_v62 = vsel %vm481_vm9, %v1112_v16, 0 }
 0x4a5   :  { %1170 = vmatpush1.bf16.msra.mxu1 %v1144_v0 }
 0x4a6   :  { %1243 = vmatprep.subr.bf16.mxu1 %v1091_v22  ;;  %v1039_v51 = vpop.permute.xlu1 %1038 }
 0x4a7   :  { %v1095_v24 = vsel %vm422_vm8, %v1037_v15, %v1039_v51  ;;  %v1096_v40 = vsel %vm422_vm8, %v1039_v51, %v1041_v48 }
 0x4a8   :  { %1204 = vmatprep.subr.bf16.mxu0 %v1095_v24  ;;  %1383 = vmatmul.mubr.msk.bf16.vlgmr.msra.gmra.mrb[4].mxu1 %vm477_vm10, %v725_v14 }
 0x4a9   :  { %1205 = vmatpush1.bf16.msra.mxu0 %v1094_v38  ;;  %1244 = vmatpush1.bf16.msra.mxu1 %v1090_v54 }
 0x4aa   :  { %1245 = vmatprep.subr.bf16.mxu1 %v1097_v3  ;;  %v1053_v25 = vpop.permute.xlu1 %1052  ;;  %1275 = vmatprep.mubr.bf16.mxu1 %v2600_v19 }
 0x4ab   :  { %v1101_v41 = vsel %vm422_vm8, %v1051_v60, %v1053_v25  ;;  %v1102_v26 = vsel %vm422_vm8, %v1053_v25, %v1055_v55 }
 0x4ac   :  { %1206 = vmatprep.subr.bf16.mxu0 %v1101_v41 }
 0x4ad   :  { %1207 = vmatpush1.bf16.msra.mxu0 %v1100_v1  ;;  %1246 = vmatpush1.bf16.msra.mxu1 %v1096_v40 }
 0x4ae   :  { %v1057_v39 = vpop.permute.xlu1 %1056 }
 0x4af   :  { %v1103_v31 = vsel %vm422_vm8, %v1055_v55, %v1057_v39  ;;  %v1285_v39 = vld [vmem:[%s2595_s7] sm:$0xff] }
 0x4b0   :  { %1247 = vmatprep.subr.bf16.mxu1 %v1103_v31 }
 0x4b1   :  { %1248 = vmatpush1.bf16.msra.mxu1 %v1102_v26 }
 0x4b2   :  { %v1067_v32 = vpop.permute.xlu1 %1066 }
 0x4b3   :  { %v1107_v2 = vsel %vm422_vm8, %v1065_v7, %v1067_v32  ;;  %v1108_v13 = vsel %vm422_vm8, %v1067_v32, %v1069_v53 }
 0x4b4   :  { %1208 = vmatprep.subr.bf16.mxu0 %v1107_v2 }
 0x4b5   :  { %1209 = vmatpush1.bf16.msra.mxu0 %v1106_v63 }
 0x4b6   :  { %v1071_v18 = vpop.permute.xlu1 %1070 }
 0x4b7   :  { %v1109_v17 = vsel %vm422_vm8, %v1069_v53, %v1071_v18 }
 0x4b8   :  { %1249 = vmatprep.subr.bf16.mxu1 %v1109_v17 }
 0x4b9   :  { %1250 = vmatpush1.bf16.msra.mxu1 %v1108_v13 }
 0x4ba   :  { %v1081_v45 = vpop.permute.xlu1 %1080 }
 0x4bb   :  { %v1113_v6 = vsel %vm422_vm8, %v1079_v61, %v1081_v45  ;;  %v1114_v50 = vsel %vm422_vm8, %v1081_v45, %v1083_v57 }
 0x4bc   :  { %1384 = vmatprep.subr.msk.bf16.mxu0 %vm481_vm9, %v1113_v6  ;;  %v1156_v42 = vsel %vm481_vm9, %v1114_v50, 0 }
 0x4bd   :  { %1211 = vmatpush1.bf16.msra.mxu0 %v1150_v62 }
 0x4be   :  { %v1085_v56 = vpop.permute.xlu1 %1084 }
 0x4bf   :  { %v1115_v29 = vsel %vm422_vm8, %v1083_v57, %v1085_v56  ;;  %v1647_v56 = vld [vmem:[#allocation2 + $0x8] sm:$0xff] }
 0x4c0   :  { %1385 = vmatmul.mubr.msk.bf16.vlgmr.msra.gmra.mrb[8].mxu0 %vm477_vm10, %v725_v14  ;;  %1386 = vmatprep.subr.msk.bf16.mxu1 %vm481_vm9, %v1115_v29 }
 0x4c1   :  { %1252 = vmatpush1.bf16.msra.mxu1 %v1156_v42  ;;  %v1648_v42 = vld [vmem:[#allocation2 + $0x10] sm:$0xff] }
 0x4c4   :  { %1387 = vmatmul.mubr.msk.bf16.vlgmr.msra.gmra.mrb[8].mxu1 %vm477_vm10, %v725_v14 }
 0x57b   :  { %v1195_v30 = vpop.f32.mrb[4].mxu1 }
 0x57c   :  { %v1286_v46 = vmul.f32 %v1195_v30, %v2117_v9  ;;  %v1197_v8 = vpop.f32.mrb[5].mxu1 }
 0x57d   :  { %v1287_v5 = vmul.f32 %v1197_v8, %v2119_v10  ;;  %v1199_v37 = vpop.f32.mrb[6].mxu1 }
 0x57e   :  { %v1300_v15 = vmul.f32 %v1286_v46, %v1286_v46  ;;  %v1200_v36 = vpop.f32.mrb[7].mxu1 }
 0x57f   :  { %v1292_v27 = vadd.f32 %v1287_v5, %v1286_v46  ;;  %v1301_v21 = vmul.f32 %v1287_v5, %v1287_v5  ;;  %v1649_v5 = vld [vmem:[#allocation2 + $0x18] sm:$0xff] }
 0x581   :  { %v1306_v43 = vadd.f32 %v1301_v21, %v1300_v15  ;;  %v1650_v15 = vld [vmem:[#allocation2 + $0x20] sm:$0xff] }
 0x593   :  { %v1236_v4 = vpop.f32.mrb[8].mxu0 }
 0x594   :  { %v1288_v11 = vmul.f32 %v1236_v4, %v2129_v20  ;;  %v1238_v48 = vpop.f32.mrb[9].mxu0 }
 0x595   :  { %v1289_v12 = vmul.f32 %v1238_v48, %v2131_v34  ;;  %v1240_v23 = vpop.f32.mrb[10].mxu0 }
 0x596   :  { %v1293_v49 = vadd.f32 %v1292_v27, %v1288_v11  ;;  %v1302_v60 = vmul.f32 %v1288_v11, %v1288_v11  ;;  %v1241_v58 = vpop.f32.mrb[11].mxu0  ;;  %v1652_v27 = vld [vmem:[#allocation2 + $0x30] sm:$0xff] }
 0x597   :  { %v1303_v9 = vmul.f32 %v1289_v12, %v1289_v12  ;;  %v1277_v59 = vpop.f32.mrb[8].mxu1 }
 0x598   :  { %v1307_v52 = vadd.f32 %v1306_v43, %v1302_v60  ;;  %v1294_v10 = vadd.f32 %v1293_v49, %v1289_v12  ;;  %v1290_v44 = vmul.f32 %v1277_v59, %v2134_v33  ;;  %v1279_v35 = vpop.f32.mrb[9].mxu1 }
 0x599   :  { %v1291_v47 = vmul.f32 %v1279_v35, %v2137_v28  ;;  %v1281_v0 = vpop.f32.mrb[10].mxu1  ;;  %v1284_v28 = vld [vmem:[%s2594_s6] sm:$0xff]  ;;  %s1713_s6 = smov [#allocation5]  }
 0x59a   :  { %v1308_v55 = vadd.f32 %v1307_v52, %v1303_v9  ;;  %v1295_v22 = vadd.f32 %v1294_v10, %v1290_v44  ;;  %v1304_v20 = vmul.f32 %v1290_v44, %v1290_v44  ;;  %v1282_v14 = vpop.f32.mrb[11].mxu1  ;;  %s1367_s7 = sshll.u32 %s1713_s6, 4  ;;  %s1368_s7 = int_to_ptr.vmem [resolvable:$true] %s1367_s7 }
 0x59b   :  { %v1305_v51 = vmul.f32 %v1291_v47, %v1291_v47  ;;  %s1675_s12 = scalar_lea.vmem %s1368_s7, 768  ;;  %p1680_p9 = scmp.lt.s32.totalorder %s1368_s7, %s1368_s7 }
 0x59c   :  { %v1309_v34 = vadd.f32 %v1308_v55, %v1304_v20  ;;  %v1296_v24 = vadd.f32 %v1295_v22, %v1291_v47  ;;  %p1676_p8 = scmp.ne.s32.totalorder %s1368_s7, %s1675_s12  ;;  %p1681_p10 = scmp.lt.s32.totalorder %s1675_s12, %s1675_s12 }
 0x59e   :  { %1297 = vadd.xlane.f32.xlu0 %v1296_v24  ;;  %v1310_v54 = vadd.f32 %v1309_v34, %v1305_v51  ;;  %p1682_p11 = por %p1681_p10, %p1680_p9 }
 0x5a0   :  { %1311 = vadd.xlane.f32.xlu1 %v1310_v54  ;;  %p1683_p12 = pnand %p1682_p11, %p1676_p8 }
 0x62b   :  { %v1298_v38 = vpop.xlane.xlu0 %1297 }
 0x62c   :  { %v1299_v3 = vmul.f32 0.001953125, %v1298_v38 }
 0x62d   :  { %v1312_v7 = vpop.xlane.xlu1 %1311 }
 0x62e   :  { %v1314_v25 = vmul.f32 %v1299_v3, %v1299_v3  ;;  %v1313_v19 = vmul.f32 0.001953125, %v1312_v7 }
 0x630   :  { %v1315_v33 = vsub.f32 %v1313_v19, %v1314_v25 }
 0x632   :  { %v1316_v41 = vadd.f32 1e-05, %v1315_v33 }
 0x634   :  { %1645 = vrsqrt.f32 %v1316_v41 }
 0x63e   :  { %v1646_v1 = vpop.eup %1645 }
 0x63f   :  { %v1318_v40 = vmul.f32 %v1646_v1, %v1284_v28 }
 0x641   :  { %1323 = vperm.xlu0 %1521, %v1318_v40   ;;  %v1319_v31 = vmul.f32 %v1318_v40, %v1299_v3 }
 0x643   :  { %v1320_v53 = vsub.f32 %v1285_v39, %v1319_v31 }
 0x645   :  { %1334 = vperm.xlu1 %1522, %v1320_v53  }
 0x6c0   :  { %v1324_v26 = vpop.permute.xlu0 %1323 }
 0x6c1   :  { %v1326_v32 = vmul.f32 %v1324_v26, %v1195_v30  ;;  %v1327_v2 = vmul.f32 %v1324_v26, %v1197_v8  ;;  %v1328_v63 = vmul.f32 %v1324_v26, %v1236_v4  ;;  %v1329_v61 = vmul.f32 %v1324_v26, %v1238_v48  ;;  %v1651_v8 = vld [vmem:[#allocation2 + $0x28] sm:$0xff] }
 0x6c2   :  { %v1330_v18 = vmul.f32 %v1324_v26, %v1277_v59  ;;  %v1331_v17 = vmul.f32 %v1324_v26, %v1279_v35 }
 0x6c4   :  { %v1335_v13 = vpop.permute.xlu1 %1334 }
 0x6c5   :  { %v1337_v16 = vadd.f32 %v1335_v13, %v1326_v32  ;;  %v1338_v45 = vadd.f32 %v1335_v13, %v1327_v2  ;;  %v1339_v6 = vadd.f32 %v1335_v13, %v1328_v63  ;;  %v1340_v57 = vadd.f32 %v1335_v13, %v1329_v61 }
 0x6c6   :  { %v1341_v62 = vadd.f32 %v1335_v13, %v1330_v18  ;;  %v1342_v50 = vadd.f32 %v1335_v13, %v1331_v17 }
 0x6c7   :  { %v1343_v29 = vadd.f32 %v1647_v56, %v1337_v16  ;;  %v1344_v46 = vadd.f32 %v1648_v42, %v1338_v45  ;;  %v1345_v37 = vadd.f32 %v1649_v5, %v1339_v6  ;;  %v1346_v30 = vadd.f32 %v1650_v15, %v1340_v57 }
 0x6c8   :  { %v1347_v36 = vadd.f32 %v1651_v8, %v1341_v62  ;;  %v1348_v21 = vadd.f32 %v1652_v27, %v1342_v50 }
 0x6c9   :  { %v1349_v43 = vmax.f32 %v1343_v29, 0.0  ;;  %v1350_v4 = vmax.f32 %v1344_v46, 0.0  ;;  %v1351_v11 = vmax.f32 %v1345_v37, 0.0  ;;  %v1352_v48 = vmax.f32 %v1346_v30, 0.0 }
 0x6ca   :  { %v1353_v12 = vmax.f32 %v1347_v36, 0.0  ;;  %v1354_v23 = vmax.f32 %v1348_v21, 0.0 }
 0x6cb   :  { %1355 = vst [vmem:[#allocation5] sm:$0xff] %v1349_v43  ;;  %1356 = vst [vmem:[#allocation5 + $0x8] sm:$0xff] %v1350_v4 }
 0x6cc   :  { %1357 = vst [vmem:[#allocation5 + $0x10] sm:$0xff] %v1351_v11  ;;  %1358 = vst [vmem:[#allocation5 + $0x18] sm:$0xff] %v1352_v48 }
 0x6cd   :  { %1359 = vst [vmem:[#allocation5 + $0x20] sm:$0xff] %v1353_v12  ;;  %1360 = vst [vmem:[#allocation5 + $0x28] sm:$0xff] %v1354_v23 }
 0x6ce   :  { %1686 = shalt.err (!%p1683_p12)
}
 0x6cf   :  { %s1687_s15 = scalar_lea.hbm %s2596_s8, 768 }
 0x6d0   :  { %p1688_p13 = scmp.ne.s32.totalorder %s2596_s8, %s1687_s15  ;;  %p1691_p0 = scmp.lt.u32.totalorder %s1687_s15, %s2596_s8 }
 0x6d2   :  { %p1693_p1 = pnand %p1691_p0, %p1688_p13 }
 0x6d4   :  { %1696 = shalt.err (!%p1693_p1)
}
 0x6d5   :  { %1370 = dma.vmem_to_hbm [thread:$0]  %s1368_s7, 768, %s2596_s8, [#allocation4]  }
 0x6d6   :  { %1699 = dma.done.wait [#allocation4], 768  }
 0x6d7   :  { %1700 = vsyncadd [#allocation4], 4294966528 }
 0x6d8   :  { %1374 = vsyncpa [#allocation3], 1 }
 0x6d9   :  { %1375 = vsyncpa [#allocation4], 1 }

</bundles_post_ra>
